<compile_context>
chip_gen: v6e
topology: v6e:2x2x1
jax: 0.10.0
libtpu: 0.0.40
codegen_flags: <defaults>
</compile_context>

<pallas_src>
import math

import numpy as np
import jax
import jax.numpy as jnp
from jax import lax
from jax.experimental import pallas as pl
from jax.experimental.pallas import tpu as pltpu


def _round_up(x, n):
    return ((x + n - 1) // n) * n


# ---------------------------------------------------------------------------
# Pallas kernels
# ---------------------------------------------------------------------------

def _conv_s2d_kernel(main_ref, halo_ref, w_ref, b_ref, opx_ref, ocm_ref):
    """Fused-im2col 3x3/stride-2 conv tile, expressed as a 2x2/stride-1 conv
    over a space-to-depth (s2d) input.

    main_ref: (1, tr, Wo+1, C4) bf16  -- s2d rows [r0, r0+tr) of one image
    halo_ref: (1, 1,  Wo+1, C4) bf16  -- s2d row r0+tr (bottom halo)
    w_ref:    (2, 2, C4, Cout)  bf16  -- s2d-rearranged conv weights (resident)
    b_ref:    (1, Cout)         f32   -- bias (resident)
    opx_ref:  (1, tr*Wo, Cout)        -- pixel-major tile (feeds next level)
    ocm_ref:  (1, Cout, tr*Wo)        -- channel-major tile (free NCHW reshape)
    """
    tr = main_ref.shape[1]
    wo = main_ref.shape[2] - 1
    c4 = main_ref.shape[3]

    win = jnp.concatenate([main_ref[0], halo_ref[0]], axis=0)   # (tr+1, Wo+1, C4)

    acc = None
    for di in (0, 1):
        for dj in (0, 1):
            xt = win[di:di + tr, dj:dj + wo, :].reshape(tr * wo, c4)
            part = jnp.dot(xt, w_ref[di, dj], preferred_element_type=jnp.float32)
            acc = part if acc is None else acc + part
    acc = jnp.maximum(acc + b_ref[...], 0.0)                     # (tr*Wo, Cout) f32

    opx_ref[0] = acc.astype(opx_ref.dtype)
    ocm_ref[0] = acc.T.astype(ocm_ref.dtype)                     # XLU transpose, on-chip


def _sine_pos_kernel(invf_ref, phase_ref, y_ref, x_ref, o_ref):
    """DETR PositionEmbeddingSine hot path, channel-major (channels x pixels).

    invf_ref/phase_ref: (D, 1) resident; rows 2k and 2k+1 share a frequency
    and odd rows carry a +pi/2 phase, so a single sin() emits the interleaved
    sin/cos channel order directly (cos(x) == sin(x + pi/2)).
    y_ref/x_ref: (1, 1, tm) normalized cumulative embeds (scaled by 2*pi).
    o_ref: (1, 2*D, tm) = [pos_y | pos_x], pixels lane-dense.
    """
    invf = invf_ref[...]                                         # (D, 1)
    phase = phase_ref[...]                                       # (D, 1)
    pos_y = jnp.sin(y_ref[0] * invf + phase)                     # (D, tm)
    pos_x = jnp.sin(x_ref[0] * invf + phase)                     # (D, tm)
    o_ref[0] = jnp.concatenate([pos_y, pos_x], axis=0).astype(o_ref.dtype)


# ---------------------------------------------------------------------------
# Wrappers (layout plumbing in plain JAX, compute in Pallas)
# ---------------------------------------------------------------------------

def conv3x3_s2_relu(x_nhwc, w, b, *, target_px=4096, out_dtype=jnp.bfloat16):
    """3x3 conv, stride 2, padding 1, + ReLU with fused im2col.
    x_nhwc: (B,H,W,Cin), w: (3,3,Cin,Cout), b: (Cout,).
    Returns (y_nhwc, y_nchw), both (B,Ho,Wo,Cout)/(B,Cout,Ho,Wo) in bf16."""
    B, H, W, Cin = x_nhwc.shape
    Cout = w.shape[-1]
    Ho, Wo = (H + 1) // 2, (W + 1) // 2
    C4 = 4 * Cin

    # Row-tile: ~target_px output pixels per grid step (amortizes ~0.35us/step),
    # shrunk for wide C4 so the double-buffered working set stays inside the
    # 32 MiB scoped-VMEM default (v7x-safe).
    budget_px = max(256, min(target_px, (2 << 20) // max(C4, 1)))
    tr = max(1, min(Ho, budget_px // max(Wo, 1)))
    # Multi-tile output blocks need a lane/sublane-aligned flattened pixel dim;
    # otherwise fall back to one row tile per image (blocks span full dims).
    while tr < Ho and (tr * Wo) % 128 != 0:
        tr += 1
    if (tr * Wo) % 128 != 0:
        tr = Ho
    Ho_pad = _round_up(Ho, tr)
    n_row_tiles = Ho_pad // tr

    # Space-to-depth of the zero-padded input: one ~1x bf16 copy, replacing the
    # previous 9x im2col slab.  xs2d[b, r, s, (p,q,c)] = xpad[b, 2r+p, 2s+q, c].
    Hpp = 2 * (Ho_pad + 1)
    Wpp = 2 * (Wo + 1)
    xpad = jnp.pad(x_nhwc.astype(jnp.bfloat16),
                   ((0, 0), (1, Hpp - 1 - H), (1, Wpp - 1 - W), (0, 0)))
    xs2d = (xpad.reshape(B, Ho_pad + 1, 2, Wo + 1, 2, Cin)
                .transpose(0, 1, 3, 2, 4, 5)
                .reshape(B, Ho_pad + 1, Wo + 1, C4))

    # 3x3 weights -> 2x2 s2d taps: ws2d[di,dj,(p,q,c),o] = w[2di+p, 2dj+q, c, o]
    # (taps past the 3x3 support are zero via the pad).
    wpad = jnp.pad(w.astype(jnp.bfloat16), ((0, 1), (0, 1), (0, 0), (0, 0)))
    ws2d = (wpad.reshape(2, 2, 2, 2, Cin, Cout)
                .transpose(0, 2, 1, 3, 4, 5)
                .reshape(2, 2, C4, Cout))
    b2d = b.astype(jnp.float32).reshape(1, Cout)

    # TODO(synk): pl.Buffered(3) on the streamed s2d block once DMA exposure is
    # measured on real image sizes (few-% win, costs one extra tile of VMEM).
    out_px, out_cm = pl.pallas_call(
        _conv_s2d_kernel,
        out_shape=(jax.ShapeDtypeStruct((B, Ho_pad * Wo, Cout), out_dtype),
                   jax.ShapeDtypeStruct((B, Cout, Ho_pad * Wo), out_dtype)),
        grid=(B, n_row_tiles),
        in_specs=[
            pl.BlockSpec((1, tr, Wo + 1, C4), lambda bi, ti: (bi, ti, 0, 0)),
            pl.BlockSpec((1, 1, Wo + 1, C4), lambda bi, ti: (bi, (ti + 1) * tr, 0, 0)),
            pl.BlockSpec((2, 2, C4, Cout), lambda bi, ti: (0, 0, 0, 0)),   # resident
            pl.BlockSpec((1, Cout), lambda bi, ti: (0, 0)),                # resident
        ],
        out_specs=(
            pl.BlockSpec((1, tr * Wo, Cout), lambda bi, ti: (bi, ti, 0)),
            pl.BlockSpec((1, Cout, tr * Wo), lambda bi, ti: (bi, 0, ti)),
        ),
        compiler_params=pltpu.CompilerParams(
            dimension_semantics=("parallel", "parallel"),
            vmem_limit_bytes=32 * 1024 * 1024),
    )(xs2d, xs2d, ws2d, b2d)

    y_nhwc = out_px.reshape(B, Ho_pad, Wo, Cout)
    y_nchw = out_cm.reshape(B, Cout, Ho_pad, Wo)      # free reshape (channel-major store)
    if Ho_pad != Ho:
        y_nhwc = y_nhwc[:, :Ho]
        y_nchw = y_nchw[:, :, :Ho]
    return y_nhwc, y_nchw


def position_embedding_sine(mask, num_pos_feats=16, temperature=10000.0,
                            dtype=jnp.float32, tile_m=8192):
    """PositionEmbeddingSine(normalize=True). mask: (B,H,W) bool (True = pad).
    Returns pos in NCHW: (B, 2*num_pos_feats, H, W) in `dtype`."""
    assert num_pos_feats % 2 == 0
    B, H, W = mask.shape
    scale = 2.0 * math.pi
    eps = 1e-6

    # cumulative-sum normalization (tiny (B,H,W) arrays; stays in XLA)
    not_mask = jnp.logical_not(mask).astype(jnp.float32)
    y_embed = jnp.cumsum(not_mask, axis=1)
    x_embed = jnp.cumsum(not_mask, axis=2)
    y_embed = y_embed / (y_embed[:, -1:, :] + eps) * scale
    x_embed = x_embed / (x_embed[:, :, -1:] + eps) * scale

    HW = H * W
    tm = min(_round_up(HW, 128), _round_up(tile_m, 128))   # lane-dense pixel tiles
    HW_pad = _round_up(HW, tm)

    y_flat = jnp.pad(y_embed.reshape(B, 1, HW), ((0, 0), (0, 0), (0, HW_pad - HW)))
    x_flat = jnp.pad(x_embed.reshape(B, 1, HW), ((0, 0), (0, 0), (0, HW_pad - HW)))

    D = num_pos_feats
    ki = jnp.arange(D)
    # inv_freq[j] = T^(-2*(j//2)/D); odd rows add pi/2 so sin() -> cos()
    inv_freq = jnp.exp((ki // 2).astype(jnp.float32)
                       * (-2.0 * math.log(temperature) / D)).reshape(D, 1)
    phase = ((ki % 2).astype(jnp.float32) * (0.5 * math.pi)).reshape(D, 1)

    pos = pl.pallas_call(
        _sine_pos_kernel,
        out_shape=jax.ShapeDtypeStruct((B, 2 * D, HW_pad), dtype),
        grid=(B, HW_pad // tm),
        in_specs=[
            pl.BlockSpec((D, 1), lambda bi, ti: (0, 0)),        # resident
            pl.BlockSpec((D, 1), lambda bi, ti: (0, 0)),        # resident
            pl.BlockSpec((1, 1, tm), lambda bi, ti: (bi, 0, ti)),
            pl.BlockSpec((1, 1, tm), lambda bi, ti: (bi, 0, ti)),
        ],
        out_specs=pl.BlockSpec((1, 2 * D, tm), lambda bi, ti: (bi, 0, ti)),
        compiler_params=pltpu.CompilerParams(
            dimension_semantics=("parallel", "parallel"),
            vmem_limit_bytes=32 * 1024 * 1024),
    )(inv_freq, phase, y_flat, x_flat)

    if HW_pad != HW:
        pos = pos[:, :, :HW]
    return pos.reshape(B, 2 * D, H, W)                         # free reshape -> NCHW


class Joiner:
    """Mirrors ecotr_backbone.Joiner.forward:
       xs = backbone(tensor_list);  out = [x for x in xs];
       pos = [pos_embed(x).astype(x.dtype) for x in xs].
    Backbone = small conv pyramid (one fused 3x3/s2 conv + ReLU per level)."""

    def __init__(self, conv_params, num_pos_feats=16):
        self.conv_params = conv_params
        self.num_pos_feats = num_pos_feats

    def __call__(self, tensors_nchw, mask):
        x = jnp.transpose(tensors_nchw, (0, 2, 3, 1))          # NCHW -> NHWC once
        H, Wfull = mask.shape[1], mask.shape[2]
        out, pos = [], []
        for (w, b) in self.conv_params:
            x, t_nchw = conv3x3_s2_relu(x, w, b)               # bf16 chain + free NCHW view
            _, Ho, Wo, _ = x.shape
            # nearest-neighbor mask downsample; index = floor(i * H / Ho),
            # matching F.interpolate(mode="nearest") rounding.
            idx_h = (jnp.arange(Ho) * H) // Ho
            idx_w = (jnp.arange(Wo) * Wfull) // Wo
            m = mask[:, idx_h][:, :, idx_w]
            out.append((t_nchw, m))                            # NestedTensor ~ (tensors, mask)
            pos.append(position_embedding_sine(m, self.num_pos_feats, dtype=t_nchw.dtype))
        return out, pos


# ---------------------------------------------------------------------------
# Demo + correctness check
# ---------------------------------------------------------------------------

if __name__ == "__main__":
    key = jax.random.PRNGKey(0)
    k_x, k_w1, k_b1, k_w2, k_b2 = jax.random.split(key, 5)

    B, Cin, H, W = 2, 4, 16, 16
    x = jax.random.normal(k_x, (B, Cin, H, W), jnp.float32)

    # padding mask (True = padded) — right strip of sample 1 is padding
    mask = jnp.zeros((B, H, W), dtype=bool)
    mask = mask.at[1, :, 12:].set(True)

    # deterministic backbone params: two conv levels 4->32->64
    C1, C2 = 32, 64
    w1 = 0.05 * jax.random.normal(k_w1, (3, 3, Cin, C1), jnp.float32)
    b1 = 0.10 * jax.random.normal(k_b1, (C1,), jnp.float32)
    w2 = 0.05 * jax.random.normal(k_w2, (3, 3, C1, C2), jnp.float32)
    b2 = 0.10 * jax.random.normal(k_b2, (C2,), jnp.float32)

    params = [(w1, b1), (w2, b2)]
    joiner = Joiner(params, num_pos_feats=16)
    fwd = jax.jit(lambda t, m: joiner(t, m))
    out, pos = fwd(x, mask)
    jax.block_until_ready((out, pos))

    # --- shape / dtype invariants of Joiner.forward ---
    for (t, m), p in zip(out, pos):
        assert p.shape[0] == t.shape[0] and p.shape[2:] == t.shape[2:]
        assert p.dtype == t.dtype
        assert m.shape == (t.shape[0],) + t.shape[2:]

    # --- pure-JAX reference (bf16-appropriate tolerances) ---
    def conv_ref(xh, wr, br):
        xb = xh.astype(jnp.bfloat16).astype(jnp.float32)
        wb = wr.astype(jnp.bfloat16).astype(jnp.float32)
        y = lax.conv_general_dilated(xb, wb, (2, 2), ((1, 1), (1, 1)),
                                     dimension_numbers=("NHWC", "HWIO", "NHWC"))
        return jnp.maximum(y + br.astype(jnp.float32), 0.0)

    def pos_ref(m, D, T=10000.0):
        nm = jnp.logical_not(m).astype(jnp.float32)
        ye, xe = jnp.cumsum(nm, 1), jnp.cumsum(nm, 2)
        sc, ep = 2.0 * math.pi, 1e-6
        ye = ye / (ye[:, -1:, :] + ep) * sc
        xe = xe / (xe[:, :, -1:] + ep) * sc
        dim_t = T ** (2.0 * (jnp.arange(D) // 2).astype(jnp.float32) / D)
        py, px = ye[..., None] / dim_t, xe[..., None] / dim_t
        py = jnp.stack([jnp.sin(py[..., 0::2]), jnp.cos(py[..., 1::2])], -1).reshape(ye.shape + (D,))
        px = jnp.stack([jnp.sin(px[..., 0::2]), jnp.cos(px[..., 1::2])], -1).reshape(xe.shape + (D,))
        return jnp.concatenate([py, px], -1).transpose(0, 3, 1, 2)

    r = jnp.transpose(x, (0, 2, 3, 1))
    for (wr, br), (t, m), p in zip(params, out, pos):
        r = conv_ref(r, wr, br)
        np.testing.assert_allclose(np.asarray(t.astype(jnp.float32)),
                                   np.asarray(jnp.transpose(r, (0, 3, 1, 2))),
                                   rtol=3e-2, atol=3e-2)
        np.testing.assert_allclose(np.asarray(p.astype(jnp.float32)),
                                   np.asarray(pos_ref(m, 16)),
                                   rtol=2e-2, atol=2e-2)
        r = r.astype(jnp.bfloat16).astype(jnp.float32)   # match bf16 inter-level chain

    print("KERNEL_OK")
</pallas_src>

<mosaic_0001>
module attributes {stable_mosaic.version = 11 : i64} {
  func.func @_conv_s2d_kernel(%arg0: i32, %arg1: i32, %arg2: memref<1x8x9x16xbf16, #tpu.memory_space<vmem>>, %arg3: memref<1x1x9x16xbf16, #tpu.memory_space<vmem>>, %arg4: memref<2x2x16x32xbf16, #tpu.memory_space<vmem>>, %arg5: memref<1x32xf32, #tpu.memory_space<vmem>>, %arg6: memref<1x64x32xbf16, #tpu.memory_space<vmem>>, %arg7: memref<1x32x64xbf16, #tpu.memory_space<vmem>>) attributes {dimension_semantics = [#tpu.dimension_semantics<parallel>, #tpu.dimension_semantics<parallel>], iteration_bounds = array<i64: 2, 1>, scalar_prefetch = 0 : i64, scratch_operands = 0 : i64, tpu.core_type = #tpu.core_type<tc>, window_params = [{transform_indices = @transform_0, window_bounds = array<i64: 1, 8, 9, 16>}, {transform_indices = @transform_1, window_bounds = array<i64: 1, 1, 9, 16>}, {pipeline_mode = #tpu.pipeline_mode<synchronous>, transform_indices = @transform_2, window_bounds = array<i64: 2, 2, 16, 32>}, {pipeline_mode = #tpu.pipeline_mode<synchronous>, transform_indices = @transform_3, window_bounds = array<i64: 1, 32>}, {transform_indices = @transform_4, window_bounds = array<i64: 1, 64, 32>}, {transform_indices = @transform_5, window_bounds = array<i64: 1, 32, 64>}]} {
    %c0 = arith.constant 0 : index
    %c0_0 = arith.constant 0 : index
    %c0_1 = arith.constant 0 : index
    %c0_2 = arith.constant 0 : index
    %0 = vector.load %arg2[%c0, %c0_0, %c0_1, %c0_2] : memref<1x8x9x16xbf16, #tpu.memory_space<vmem>>, vector<1x8x9x16xbf16>
    %1 = vector.shape_cast %0 : vector<1x8x9x16xbf16> to vector<8x9x16xbf16>
    %c0_3 = arith.constant 0 : index
    %c0_4 = arith.constant 0 : index
    %c0_5 = arith.constant 0 : index
    %c0_6 = arith.constant 0 : index
    %2 = vector.load %arg3[%c0_3, %c0_4, %c0_5, %c0_6] : memref<1x1x9x16xbf16, #tpu.memory_space<vmem>>, vector<1x1x9x16xbf16>
    %3 = vector.shape_cast %2 : vector<1x1x9x16xbf16> to vector<1x9x16xbf16>
    %4 = tpu.concatenate %1, %3 in 0 : vector<8x9x16xbf16>, vector<1x9x16xbf16> -> vector<9x9x16xbf16>
    %5 = vector.extract_strided_slice %4 {offsets = [0, 0, 0], sizes = [8, 8, 16], strides = [1, 1, 1]} : vector<9x9x16xbf16> to vector<8x8x16xbf16>
    %6 = vector.shape_cast %5 : vector<8x8x16xbf16> to vector<64x16xbf16>
    %c0_7 = arith.constant 0 : index
    %c0_8 = arith.constant 0 : index
    %c0_9 = arith.constant 0 : index
    %c0_10 = arith.constant 0 : index
    %7 = vector.load %arg4[%c0_7, %c0_8, %c0_9, %c0_10] : memref<2x2x16x32xbf16, #tpu.memory_space<vmem>>, vector<1x1x16x32xbf16>
    %8 = vector.shape_cast %7 : vector<1x1x16x32xbf16> to vector<16x32xbf16>
    %cst = arith.constant dense<0.000000e+00> : vector<64x32xf32>
    %9 = tpu.matmul %6, %8, %cst {dimension_numbers = #tpu.dot_dimension_numbers<[1], [0], [0], [1], [0, 0, 1, 1], [], []>} : vector<64x16xbf16>, vector<16x32xbf16>, vector<64x32xf32> -> vector<64x32xf32>
    %10 = vector.extract_strided_slice %4 {offsets = [0, 1, 0], sizes = [8, 8, 16], strides = [1, 1, 1]} : vector<9x9x16xbf16> to vector<8x8x16xbf16>
    %11 = vector.shape_cast %10 : vector<8x8x16xbf16> to vector<64x16xbf16>
    %c0_11 = arith.constant 0 : index
    %c1 = arith.constant 1 : index
    %c0_12 = arith.constant 0 : index
    %c0_13 = arith.constant 0 : index
    %12 = vector.load %arg4[%c0_11, %c1, %c0_12, %c0_13] : memref<2x2x16x32xbf16, #tpu.memory_space<vmem>>, vector<1x1x16x32xbf16>
    %13 = vector.shape_cast %12 : vector<1x1x16x32xbf16> to vector<16x32xbf16>
    %cst_14 = arith.constant dense<0.000000e+00> : vector<64x32xf32>
    %14 = tpu.matmul %11, %13, %cst_14 {dimension_numbers = #tpu.dot_dimension_numbers<[1], [0], [0], [1], [0, 0, 1, 1], [], []>} : vector<64x16xbf16>, vector<16x32xbf16>, vector<64x32xf32> -> vector<64x32xf32>
    %15 = arith.addf %9, %14 : vector<64x32xf32>
    %16 = vector.extract_strided_slice %4 {offsets = [1, 0, 0], sizes = [8, 8, 16], strides = [1, 1, 1]} : vector<9x9x16xbf16> to vector<8x8x16xbf16>
    %17 = vector.shape_cast %16 : vector<8x8x16xbf16> to vector<64x16xbf16>
    %c1_15 = arith.constant 1 : index
    %c0_16 = arith.constant 0 : index
    %c0_17 = arith.constant 0 : index
    %c0_18 = arith.constant 0 : index
    %18 = vector.load %arg4[%c1_15, %c0_16, %c0_17, %c0_18] : memref<2x2x16x32xbf16, #tpu.memory_space<vmem>>, vector<1x1x16x32xbf16>
    %19 = vector.shape_cast %18 : vector<1x1x16x32xbf16> to vector<16x32xbf16>
    %cst_19 = arith.constant dense<0.000000e+00> : vector<64x32xf32>
    %20 = tpu.matmul %17, %19, %cst_19 {dimension_numbers = #tpu.dot_dimension_numbers<[1], [0], [0], [1], [0, 0, 1, 1], [], []>} : vector<64x16xbf16>, vector<16x32xbf16>, vector<64x32xf32> -> vector<64x32xf32>
    %21 = arith.addf %15, %20 : vector<64x32xf32>
    %22 = vector.extract_strided_slice %4 {offsets = [1, 1, 0], sizes = [8, 8, 16], strides = [1, 1, 1]} : vector<9x9x16xbf16> to vector<8x8x16xbf16>
    %23 = vector.shape_cast %22 : vector<8x8x16xbf16> to vector<64x16xbf16>
    %c1_20 = arith.constant 1 : index
    %c1_21 = arith.constant 1 : index
    %c0_22 = arith.constant 0 : index
    %c0_23 = arith.constant 0 : index
    %24 = vector.load %arg4[%c1_20, %c1_21, %c0_22, %c0_23] : memref<2x2x16x32xbf16, #tpu.memory_space<vmem>>, vector<1x1x16x32xbf16>
    %25 = vector.shape_cast %24 : vector<1x1x16x32xbf16> to vector<16x32xbf16>
    %cst_24 = arith.constant dense<0.000000e+00> : vector<64x32xf32>
    %26 = tpu.matmul %23, %25, %cst_24 {dimension_numbers = #tpu.dot_dimension_numbers<[1], [0], [0], [1], [0, 0, 1, 1], [], []>} : vector<64x16xbf16>, vector<16x32xbf16>, vector<64x32xf32> -> vector<64x32xf32>
    %27 = arith.addf %21, %26 : vector<64x32xf32>
    %c0_25 = arith.constant 0 : index
    %c0_26 = arith.constant 0 : index
    %28 = vector.load %arg5[%c0_25, %c0_26] : memref<1x32xf32, #tpu.memory_space<vmem>>, vector<1x32xf32>
    %29 = vector.broadcast %28 : vector<1x32xf32> to vector<64x32xf32>
    %30 = arith.addf %27, %29 : vector<64x32xf32>
    %cst_27 = arith.constant 0.000000e+00 : f32
    %31 = vector.broadcast %cst_27 : f32 to vector<64x32xf32>
    %32 = arith.maximumf %30, %31 : vector<64x32xf32>
    %33 = arith.truncf %32 : vector<64x32xf32> to vector<64x32xbf16>
    %c0_28 = arith.constant 0 : index
    %c0_29 = arith.constant 0 : index
    %c0_30 = arith.constant 0 : index
    %34 = vector.load %arg6[%c0_28, %c0_29, %c0_30] : memref<1x64x32xbf16, #tpu.memory_space<vmem>>, vector<1x64x32xbf16>
    %35 = vector.shape_cast %34 : vector<1x64x32xbf16> to vector<64x32xbf16>
    %36 = vector.shape_cast %33 : vector<64x32xbf16> to vector<1x64x32xbf16>
    tpu.vector_store %arg6[%c0_28, %c0_29, %c0_30], %36 {strides = array<i32>} : memref<1x64x32xbf16, #tpu.memory_space<vmem>>, vector<1x64x32xbf16>,
    %37 = tpu.transpose %32, [1, 0] : vector<64x32xf32> -> vector<32x64xf32>
    %38 = arith.truncf %37 : vector<32x64xf32> to vector<32x64xbf16>
    %c0_31 = arith.constant 0 : index
    %c0_32 = arith.constant 0 : index
    %c0_33 = arith.constant 0 : index
    %39 = vector.load %arg7[%c0_31, %c0_32, %c0_33] : memref<1x32x64xbf16, #tpu.memory_space<vmem>>, vector<1x32x64xbf16>
    %40 = vector.shape_cast %39 : vector<1x32x64xbf16> to vector<32x64xbf16>
    %41 = vector.shape_cast %38 : vector<32x64xbf16> to vector<1x32x64xbf16>
    tpu.vector_store %arg7[%c0_31, %c0_32, %c0_33], %41 {strides = array<i32>} : memref<1x32x64xbf16, #tpu.memory_space<vmem>>, vector<1x32x64xbf16>,
    return
  }
  func.func @transform_0(%arg0: i32, %arg1: i32) -> (i32, i32, i32, i32) {
    %c0_i32 = arith.constant 0 : i32
    %c0_i32_0 = arith.constant 0 : i32
    %c0_i32_1 = arith.constant 0 : i32
    return %arg0, %arg1, %c0_i32, %c0_i32_0 : i32, i32, i32, i32
  }
  func.func @transform_1(%arg0: i32, %arg1: i32) -> (i32, i32, i32, i32) {
    %c1_i32 = arith.constant 1 : i32
    %0 = arith.addi %arg1, %c1_i32 : i32
    %c8_i32 = arith.constant 8 : i32
    %1 = arith.muli %0, %c8_i32 : i32
    %c0_i32 = arith.constant 0 : i32
    %c0_i32_0 = arith.constant 0 : i32
    %c0_i32_1 = arith.constant 0 : i32
    return %arg0, %1, %c0_i32, %c0_i32_0 : i32, i32, i32, i32
  }
  func.func @transform_2(%arg0: i32, %arg1: i32) -> (i32, i32, i32, i32) {
    %c0_i32 = arith.constant 0 : i32
    %c0_i32_0 = arith.constant 0 : i32
    %c0_i32_1 = arith.constant 0 : i32
    %c0_i32_2 = arith.constant 0 : i32
    %c0_i32_3 = arith.constant 0 : i32
    return %c0_i32, %c0_i32_0, %c0_i32_1, %c0_i32_2 : i32, i32, i32, i32
  }
  func.func @transform_3(%arg0: i32, %arg1: i32) -> (i32, i32) {
    %c0_i32 = arith.constant 0 : i32
    %c0_i32_0 = arith.constant 0 : i32
    %c0_i32_1 = arith.constant 0 : i32
    return %c0_i32, %c0_i32_0 : i32, i32
  }
  func.func @transform_4(%arg0: i32, %arg1: i32) -> (i32, i32, i32) {
    %c0_i32 = arith.constant 0 : i32
    %c0_i32_0 = arith.constant 0 : i32
    return %arg0, %arg1, %c0_i32 : i32, i32, i32
  }
  func.func @transform_5(%arg0: i32, %arg1: i32) -> (i32, i32, i32) {
    %c0_i32 = arith.constant 0 : i32
    %c0_i32_0 = arith.constant 0 : i32
    return %arg0, %c0_i32, %arg1 : i32, i32, i32
  }
}

module attributes {stable_mosaic.version = 11 : i64} {
  func.func @_conv_s2d_kernel(%arg0: i32, %arg1: i32, %arg2: memref<1x4x5x128xbf16, #tpu.memory_space<vmem>>, %arg3: memref<1x1x5x128xbf16, #tpu.memory_space<vmem>>, %arg4: memref<2x2x128x64xbf16, #tpu.memory_space<vmem>>, %arg5: memref<1x64xf32, #tpu.memory_space<vmem>>, %arg6: memref<1x16x64xbf16, #tpu.memory_space<vmem>>, %arg7: memref<1x64x16xbf16, #tpu.memory_space<vmem>>) attributes {dimension_semantics = [#tpu.dimension_semantics<parallel>, #tpu.dimension_semantics<parallel>], iteration_bounds = array<i64: 2, 1>, scalar_prefetch = 0 : i64, scratch_operands = 0 : i64, tpu.core_type = #tpu.core_type<tc>, window_params = [{transform_indices = @transform_0, window_bounds = array<i64: 1, 4, 5, 128>}, {transform_indices = @transform_1, window_bounds = array<i64: 1, 1, 5, 128>}, {pipeline_mode = #tpu.pipeline_mode<synchronous>, transform_indices = @transform_2, window_bounds = array<i64: 2, 2, 128, 64>}, {pipeline_mode = #tpu.pipeline_mode<synchronous>, transform_indices = @transform_3, window_bounds = array<i64: 1, 64>}, {transform_indices = @transform_4, window_bounds = array<i64: 1, 16, 64>}, {transform_indices = @transform_5, window_bounds = array<i64: 1, 64, 16>}]} {
    %c0 = arith.constant 0 : index
    %c0_0 = arith.constant 0 : index
    %c0_1 = arith.constant 0 : index
    %c0_2 = arith.constant 0 : index
    %0 = vector.load %arg2[%c0, %c0_0, %c0_1, %c0_2] : memref<1x4x5x128xbf16, #tpu.memory_space<vmem>>, vector<1x4x5x128xbf16>
    %1 = vector.shape_cast %0 : vector<1x4x5x128xbf16> to vector<4x5x128xbf16>
    %c0_3 = arith.constant 0 : index
    %c0_4 = arith.constant 0 : index
    %c0_5 = arith.constant 0 : index
    %c0_6 = arith.constant 0 : index
    %2 = vector.load %arg3[%c0_3, %c0_4, %c0_5, %c0_6] : memref<1x1x5x128xbf16, #tpu.memory_space<vmem>>, vector<1x1x5x128xbf16>
    %3 = vector.shape_cast %2 : vector<1x1x5x128xbf16> to vector<1x5x128xbf16>
    %4 = tpu.concatenate %1, %3 in 0 : vector<4x5x128xbf16>, vector<1x5x128xbf16> -> vector<5x5x128xbf16>
    %5 = vector.extract_strided_slice %4 {offsets = [0, 0, 0], sizes = [4, 4, 128], strides = [1, 1, 1]} : vector<5x5x128xbf16> to vector<4x4x128xbf16>
    %6 = vector.shape_cast %5 : vector<4x4x128xbf16> to vector<16x128xbf16>
    %c0_7 = arith.constant 0 : index
    %c0_8 = arith.constant 0 : index
    %c0_9 = arith.constant 0 : index
    %c0_10 = arith.constant 0 : index
    %7 = vector.load %arg4[%c0_7, %c0_8, %c0_9, %c0_10] : memref<2x2x128x64xbf16, #tpu.memory_space<vmem>>, vector<1x1x128x64xbf16>
    %8 = vector.shape_cast %7 : vector<1x1x128x64xbf16> to vector<128x64xbf16>
    %cst = arith.constant dense<0.000000e+00> : vector<16x64xf32>
    %9 = tpu.matmul %6, %8, %cst {dimension_numbers = #tpu.dot_dimension_numbers<[1], [0], [0], [1], [0, 0, 1, 1], [], []>} : vector<16x128xbf16>, vector<128x64xbf16>, vector<16x64xf32> -> vector<16x64xf32>
    %10 = vector.extract_strided_slice %4 {offsets = [0, 1, 0], sizes = [4, 4, 128], strides = [1, 1, 1]} : vector<5x5x128xbf16> to vector<4x4x128xbf16>
    %11 = vector.shape_cast %10 : vector<4x4x128xbf16> to vector<16x128xbf16>
    %c0_11 = arith.constant 0 : index
    %c1 = arith.constant 1 : index
    %c0_12 = arith.constant 0 : index
    %c0_13 = arith.constant 0 : index
    %12 = vector.load %arg4[%c0_11, %c1, %c0_12, %c0_13] : memref<2x2x128x64xbf16, #tpu.memory_space<vmem>>, vector<1x1x128x64xbf16>
    %13 = vector.shape_cast %12 : vector<1x1x128x64xbf16> to vector<128x64xbf16>
    %cst_14 = arith.constant dense<0.000000e+00> : vector<16x64xf32>
    %14 = tpu.matmul %11, %13, %cst_14 {dimension_numbers = #tpu.dot_dimension_numbers<[1], [0], [0], [1], [0, 0, 1, 1], [], []>} : vector<16x128xbf16>, vector<128x64xbf16>, vector<16x64xf32> -> vector<16x64xf32>
    %15 = arith.addf %9, %14 : vector<16x64xf32>
    %16 = vector.extract_strided_slice %4 {offsets = [1, 0, 0], sizes = [4, 4, 128], strides = [1, 1, 1]} : vector<5x5x128xbf16> to vector<4x4x128xbf16>
    %17 = vector.shape_cast %16 : vector<4x4x128xbf16> to vector<16x128xbf16>
    %c1_15 = arith.constant 1 : index
    %c0_16 = arith.constant 0 : index
    %c0_17 = arith.constant 0 : index
    %c0_18 = arith.constant 0 : index
    %18 = vector.load %arg4[%c1_15, %c0_16, %c0_17, %c0_18] : memref<2x2x128x64xbf16, #tpu.memory_space<vmem>>, vector<1x1x128x64xbf16>
    %19 = vector.shape_cast %18 : vector<1x1x128x64xbf16> to vector<128x64xbf16>
    %cst_19 = arith.constant dense<0.000000e+00> : vector<16x64xf32>
    %20 = tpu.matmul %17, %19, %cst_19 {dimension_numbers = #tpu.dot_dimension_numbers<[1], [0], [0], [1], [0, 0, 1, 1], [], []>} : vector<16x128xbf16>, vector<128x64xbf16>, vector<16x64xf32> -> vector<16x64xf32>
    %21 = arith.addf %15, %20 : vector<16x64xf32>
    %22 = vector.extract_strided_slice %4 {offsets = [1, 1, 0], sizes = [4, 4, 128], strides = [1, 1, 1]} : vector<5x5x128xbf16> to vector<4x4x128xbf16>
    %23 = vector.shape_cast %22 : vector<4x4x128xbf16> to vector<16x128xbf16>
    %c1_20 = arith.constant 1 : index
    %c1_21 = arith.constant 1 : index
    %c0_22 = arith.constant 0 : index
    %c0_23 = arith.constant 0 : index
    %24 = vector.load %arg4[%c1_20, %c1_21, %c0_22, %c0_23] : memref<2x2x128x64xbf16, #tpu.memory_space<vmem>>, vector<1x1x128x64xbf16>
    %25 = vector.shape_cast %24 : vector<1x1x128x64xbf16> to vector<128x64xbf16>
    %cst_24 = arith.constant dense<0.000000e+00> : vector<16x64xf32>
    %26 = tpu.matmul %23, %25, %cst_24 {dimension_numbers = #tpu.dot_dimension_numbers<[1], [0], [0], [1], [0, 0, 1, 1], [], []>} : vector<16x128xbf16>, vector<128x64xbf16>, vector<16x64xf32> -> vector<16x64xf32>
    %27 = arith.addf %21, %26 : vector<16x64xf32>
    %c0_25 = arith.constant 0 : index
    %c0_26 = arith.constant 0 : index
    %28 = vector.load %arg5[%c0_25, %c0_26] : memref<1x64xf32, #tpu.memory_space<vmem>>, vector<1x64xf32>
    %29 = vector.broadcast %28 : vector<1x64xf32> to vector<16x64xf32>
    %30 = arith.addf %27, %29 : vector<16x64xf32>
    %cst_27 = arith.constant 0.000000e+00 : f32
    %31 = vector.broadcast %cst_27 : f32 to vector<16x64xf32>
    %32 = arith.maximumf %30, %31 : vector<16x64xf32>
    %33 = arith.truncf %32 : vector<16x64xf32> to vector<16x64xbf16>
    %c0_28 = arith.constant 0 : index
    %c0_29 = arith.constant 0 : index
    %c0_30 = arith.constant 0 : index
    %34 = vector.load %arg6[%c0_28, %c0_29, %c0_30] : memref<1x16x64xbf16, #tpu.memory_space<vmem>>, vector<1x16x64xbf16>
    %35 = vector.shape_cast %34 : vector<1x16x64xbf16> to vector<16x64xbf16>
    %36 = vector.shape_cast %33 : vector<16x64xbf16> to vector<1x16x64xbf16>
    tpu.vector_store %arg6[%c0_28, %c0_29, %c0_30], %36 {strides = array<i32>} : memref<1x16x64xbf16, #tpu.memory_space<vmem>>, vector<1x16x64xbf16>,
    %37 = tpu.transpose %32, [1, 0] : vector<16x64xf32> -> vector<64x16xf32>
    %38 = arith.truncf %37 : vector<64x16xf32> to vector<64x16xbf16>
    %c0_31 = arith.constant 0 : index
    %c0_32 = arith.constant 0 : index
    %c0_33 = arith.constant 0 : index
    %39 = vector.load %arg7[%c0_31, %c0_32, %c0_33] : memref<1x64x16xbf16, #tpu.memory_space<vmem>>, vector<1x64x16xbf16>
    %40 = vector.shape_cast %39 : vector<1x64x16xbf16> to vector<64x16xbf16>
    %41 = vector.shape_cast %38 : vector<64x16xbf16> to vector<1x64x16xbf16>
    tpu.vector_store %arg7[%c0_31, %c0_32, %c0_33], %41 {strides = array<i32>} : memref<1x64x16xbf16, #tpu.memory_space<vmem>>, vector<1x64x16xbf16>,
    return
  }
  func.func @transform_0(%arg0: i32, %arg1: i32) -> (i32, i32, i32, i32) {
    %c0_i32 = arith.constant 0 : i32
    %c0_i32_0 = arith.constant 0 : i32
    %c0_i32_1 = arith.constant 0 : i32
    return %arg0, %arg1, %c0_i32, %c0_i32_0 : i32, i32, i32, i32
  }
  func.func @transform_1(%arg0: i32, %arg1: i32) -> (i32, i32, i32, i32) {
    %c1_i32 = arith.constant 1 : i32
    %0 = arith.addi %arg1, %c1_i32 : i32
    %c4_i32 = arith.constant 4 : i32
    %1 = arith.muli %0, %c4_i32 : i32
    %c0_i32 = arith.constant 0 : i32
    %c0_i32_0 = arith.constant 0 : i32
    %c0_i32_1 = arith.constant 0 : i32
    return %arg0, %1, %c0_i32, %c0_i32_0 : i32, i32, i32, i32
  }
  func.func @transform_2(%arg0: i32, %arg1: i32) -> (i32, i32, i32, i32) {
    %c0_i32 = arith.constant 0 : i32
    %c0_i32_0 = arith.constant 0 : i32
    %c0_i32_1 = arith.constant 0 : i32
    %c0_i32_2 = arith.constant 0 : i32
    %c0_i32_3 = arith.constant 0 : i32
    return %c0_i32, %c0_i32_0, %c0_i32_1, %c0_i32_2 : i32, i32, i32, i32
  }
  func.func @transform_3(%arg0: i32, %arg1: i32) -> (i32, i32) {
    %c0_i32 = arith.constant 0 : i32
    %c0_i32_0 = arith.constant 0 : i32
    %c0_i32_1 = arith.constant 0 : i32
    return %c0_i32, %c0_i32_0 : i32, i32
  }
  func.func @transform_4(%arg0: i32, %arg1: i32) -> (i32, i32, i32) {
    %c0_i32 = arith.constant 0 : i32
    %c0_i32_0 = arith.constant 0 : i32
    return %arg0, %arg1, %c0_i32 : i32, i32, i32
  }
  func.func @transform_5(%arg0: i32, %arg1: i32) -> (i32, i32, i32) {
    %c0_i32 = arith.constant 0 : i32
    %c0_i32_0 = arith.constant 0 : i32
    return %arg0, %c0_i32, %arg1 : i32, i32, i32
  }
}

module attributes {stable_mosaic.version = 11 : i64} {
  func.func @_sine_pos_kernel(%arg0: i32, %arg1: i32, %arg2: memref<16x1xf32, #tpu.memory_space<vmem>>, %arg3: memref<16x1xf32, #tpu.memory_space<vmem>>, %arg4: memref<1x1x128xf32, #tpu.memory_space<vmem>>, %arg5: memref<1x1x128xf32, #tpu.memory_space<vmem>>, %arg6: memref<1x32x128xbf16, #tpu.memory_space<vmem>>) attributes {dimension_semantics = [#tpu.dimension_semantics<parallel>, #tpu.dimension_semantics<parallel>], iteration_bounds = array<i64: 2, 1>, scalar_prefetch = 0 : i64, scratch_operands = 0 : i64, tpu.core_type = #tpu.core_type<tc>, window_params = [{pipeline_mode = #tpu.pipeline_mode<synchronous>, transform_indices = @transform_0, window_bounds = array<i64: 16, 1>}, {pipeline_mode = #tpu.pipeline_mode<synchronous>, transform_indices = @transform_1, window_bounds = array<i64: 16, 1>}, {transform_indices = @transform_2, window_bounds = array<i64: 1, 1, 128>}, {transform_indices = @transform_3, window_bounds = array<i64: 1, 1, 128>}, {transform_indices = @transform_4, window_bounds = array<i64: 1, 32, 128>}]} {
    %c0 = arith.constant 0 : index
    %c0_0 = arith.constant 0 : index
    %0 = vector.load %arg2[%c0, %c0_0] : memref<16x1xf32, #tpu.memory_space<vmem>>, vector<16x1xf32>
    %c0_1 = arith.constant 0 : index
    %c0_2 = arith.constant 0 : index
    %1 = vector.load %arg3[%c0_1, %c0_2] : memref<16x1xf32, #tpu.memory_space<vmem>>, vector<16x1xf32>
    %c0_3 = arith.constant 0 : index
    %c0_4 = arith.constant 0 : index
    %c0_5 = arith.constant 0 : index
    %2 = vector.load %arg4[%c0_3, %c0_4, %c0_5] : memref<1x1x128xf32, #tpu.memory_space<vmem>>, vector<1x1x128xf32>
    %3 = vector.shape_cast %2 : vector<1x1x128xf32> to vector<1x128xf32>
    %4 = vector.broadcast %3 : vector<1x128xf32> to vector<16x128xf32>
    %5 = vector.broadcast %0 : vector<16x1xf32> to vector<16x128xf32>
    %6 = arith.mulf %4, %5 : vector<16x128xf32>
    %7 = vector.broadcast %1 : vector<16x1xf32> to vector<16x128xf32>
    %8 = arith.addf %6, %7 : vector<16x128xf32>
    %9 = math.sin %8 : vector<16x128xf32>
    %c0_6 = arith.constant 0 : index
    %c0_7 = arith.constant 0 : index
    %c0_8 = arith.constant 0 : index
    %10 = vector.load %arg5[%c0_6, %c0_7, %c0_8] : memref<1x1x128xf32, #tpu.memory_space<vmem>>, vector<1x1x128xf32>
    %11 = vector.shape_cast %10 : vector<1x1x128xf32> to vector<1x128xf32>
    %12 = vector.broadcast %11 : vector<1x128xf32> to vector<16x128xf32>
    %13 = vector.broadcast %0 : vector<16x1xf32> to vector<16x128xf32>
    %14 = arith.mulf %12, %13 : vector<16x128xf32>
    %15 = vector.broadcast %1 : vector<16x1xf32> to vector<16x128xf32>
    %16 = arith.addf %14, %15 : vector<16x128xf32>
    %17 = math.sin %16 : vector<16x128xf32>
    %18 = tpu.concatenate %9, %17 in 0 : vector<16x128xf32>, vector<16x128xf32> -> vector<32x128xf32>
    %19 = arith.truncf %18 : vector<32x128xf32> to vector<32x128xbf16>
    %c0_9 = arith.constant 0 : index
    %c0_10 = arith.constant 0 : index
    %c0_11 = arith.constant 0 : index
    %20 = vector.load %arg6[%c0_9, %c0_10, %c0_11] : memref<1x32x128xbf16, #tpu.memory_space<vmem>>, vector<1x32x128xbf16>
    %21 = vector.shape_cast %20 : vector<1x32x128xbf16> to vector<32x128xbf16>
    %22 = vector.shape_cast %19 : vector<32x128xbf16> to vector<1x32x128xbf16>
    tpu.vector_store %arg6[%c0_9, %c0_10, %c0_11], %22 {strides = array<i32>} : memref<1x32x128xbf16, #tpu.memory_space<vmem>>, vector<1x32x128xbf16>,
    return
  }
  func.func @transform_0(%arg0: i32, %arg1: i32) -> (i32, i32) {
    %c0_i32 = arith.constant 0 : i32
    %c0_i32_0 = arith.constant 0 : i32
    %c0_i32_1 = arith.constant 0 : i32
    return %c0_i32, %c0_i32_0 : i32, i32
  }
  func.func @transform_1(%arg0: i32, %arg1: i32) -> (i32, i32) {
    %c0_i32 = arith.constant 0 : i32
    %c0_i32_0 = arith.constant 0 : i32
    %c0_i32_1 = arith.constant 0 : i32
    return %c0_i32, %c0_i32_0 : i32, i32
  }
  func.func @transform_2(%arg0: i32, %arg1: i32) -> (i32, i32, i32) {
    %c0_i32 = arith.constant 0 : i32
    %c0_i32_0 = arith.constant 0 : i32
    return %arg0, %c0_i32, %arg1 : i32, i32, i32
  }
  func.func @transform_3(%arg0: i32, %arg1: i32) -> (i32, i32, i32) {
    %c0_i32 = arith.constant 0 : i32
    %c0_i32_0 = arith.constant 0 : i32
    return %arg0, %c0_i32, %arg1 : i32, i32, i32
  }
  func.func @transform_4(%arg0: i32, %arg1: i32) -> (i32, i32, i32) {
    %c0_i32 = arith.constant 0 : i32
    %c0_i32_0 = arith.constant 0 : i32
    return %arg0, %c0_i32, %arg1 : i32, i32, i32
  }
}

</mosaic_0001>

<bundles_post_ra>
// kernel: _lambda_.4
= control target key start
LH: loop header
LB: loop body
LE: loop exit
PB: predicated region body
PF: predicated region fallthrough
CT: control target
= control target key end

     0   :  { %s1424_s18 = smov 0   ;;  %s1426_s19 = smov 0   ;;  %s1607_s0 = inlined_call_operand.vmem [shape: bf16[2,9,9,16], index: 0, kind: input, shape index: {}, may-alias: {0,1}]   ;;  %s1608_s1 = inlined_call_operand.vmem [shape: bf16[2,9,9,16], index: 1, kind: input, shape index: {}, may-alias: {0,1}]   ;;  %s1609_s2 = inlined_call_operand.vmem [shape: bf16[2,2,16,32], index: 2, kind: input, shape index: {}]   ;;  %s1610_s3 = inlined_call_operand.vmem [shape: f32[1,32], index: 3, kind: input, shape index: {}]   ;;  %s1611_s4 = inlined_call_operand.vmem [shape: bf16[2,64,32], index: 4, kind: output, shape index: {0}]   ;;  %s1612_s5 = inlined_call_operand.vmem [shape: bf16[2,32,64], index: 5, kind: output, shape index: {1}]  }
   0x1   :  { %s1428_s20 = smov 0  }
   0x2 LB: > { %s28_s21 = sadd.s32 1, %s1388_s19  ;;  %p1191_p0 = scmp.ge.s32.totalorder %s1392_s20, 1  ;;  %s1392_s20 = sphi %s1428_s20, %s16_s20   ;;  %s1388_s19 = sphi %s1426_s19, %s1616_s19   ;;  %s1384_s18 = sphi %s1424_s18, %s1615_s18  }
   0x3   : > { %p30_p1 = scmp.ge.s32.totalorder %s28_s21, 2  ;;  %p248_p2 = scmp.lt.s32.totalorder %s1392_s20, 3 }
   0x5   : > { %s1618_s21 = smov (%p30_p1, %s28_s21), 0  ;;  %p249_p3 = pnand %p1191_p0, %p248_p2 }
   0x6   : > { %p315_p4 = scmp.lt.s32.totalorder (!%p249_p3), %s1384_s18, 1 }
   0x7   : > { %252 = sbr.rel (%p249_p3) target bundleno = 394 (0x18a), region = 36 }
   0xc   : > { %v1359_v0 = vld [vmem:[%s1609_s2] sm:$0xff]   ;;  %v1360_v1 = vld [vmem:[%s1609_s2 + $0x8] sm:$0xff]   ;;  %s1620_s18 = smov (!%p315_p4, %s1384_s18), 1  ;;  %v1453_v2 = vld [vmem:[%s1609_s2 + $0x10] sm:$0xff]   ;;  %vm518_vm0 = vcmask 130048   ;;  %vm967_vm4 = vcmask 257024  }
   0xd   : > { %1301 = vmatprep.subr.bf16.mxu1 %v1359_v0  ;;  %1291 = vmatprep.subr.bf16.mxu0 %v1360_v1  ;;  %s1331_s28 = smul.u32 72, %s1620_s18  ;;  %v1364_v3 = vld [vmem:[%s1609_s2 + $0x18] sm:$0xff]   ;;  %vm382_vm1 = vsmask.f32 3328  ;;  %vm383_vm2 = vsmask.f32 7440 }
   0xe   : > { %1302 = vmatpush3.bf16.msra.mxu1 %v1359_v0  ;;  %1292 = vmatpush3.bf16.msra.mxu0 %v1360_v1  ;;  %vm1493_vm3 = vmor %vm382_vm1, %vm383_vm2  ;;  %s1257_s15 = sshll.u32 %s1620_s18, 5  ;;  %s1258_s23 = sshll.u32 %s1620_s18, 4  ;;  %vm1024_vm5 = vcmask 519168  }
   0xf   : > { %1311 = vmatprep.subr.bf16.mxu0 %v1453_v2  ;;  %s1465_s8 = scalar_lea.vmem %s1607_s0, %s1331_s28  ;;  %1321 = vmatprep.subr.bf16.mxu1 %v1364_v3  ;;  %s1256_s9 = sadd.s32 64, %s1331_s28 }
  0x10   : > { %v362_v4 = vld [vmem:[%s1465_s8] sm:$0xf]  ;;  %v1469_v5 = vld [vmem:[%s1465_s8 + $0x8] sm:$0xf]  ;;  %v1472_v6 = vld [vmem:[%s1465_s8 + $0x10] sm:$0xf]  ;;  %s340_s12 = scalar_lea.vmem %s1608_s1, %s1256_s9  ;;  %s1576_s22 = scalar_lea.vmem %s1611_s4, %s1257_s15 }
  0x11   : > { %v386_v7 = vshrl.u32 %v362_v4, 16  ;;  %v389_v8 = vshll.u32 %v362_v4, 16  ;;  %v400_v9 = vshrl.u32 %v1469_v5, 16  ;;  %v403_v10 = vshll.u32 %v1469_v5, 16  ;;  %v1477_v11 = vld [vmem:[%s1465_s8 + $0x18] sm:$0xf]  ;;  %s360_s26 = scalar_lea.vmem %s1612_s5, %s1258_s23 }
  0x12   : > { %v1209_v12 = vcombine.low %v362_v4, %v1469_v5  ;;  %v1210_v13 = vcombine.low %v1472_v6, %v1477_v11  ;;  %v363_v14 = vld [vmem:[%s1465_s8 + $0x4] sm:$0x1]  ;;  %v365_v15 = vld [vmem:[%s1465_s8 + $0xc] sm:$0x1]  ;;  %v367_v16 = vld [vmem:[%s1465_s8 + $0x14] sm:$0x1] }
  0x13   : > { %v388_v17 = vrot.slane %v386_v7, 4  ;;  %v391_v18 = vrot.slane %v389_v8, 5  ;;  %v395_v19 = vshll.u32 %v363_v14, 16  ;;  %v402_v20 = vrot.slane %v400_v9, 4  ;;  %v369_v23 = vld [vmem:[%s1465_s8 + $0x1c] sm:$0x1] }
  0x14   : > { %1303 = vmatprep.mubr.msk.bf16.mxu1 %vm518_vm0, %v1209_v12  ;;  %v405_v21 = vrot.slane %v403_v10, 5  ;;  %v409_v22 = vshll.u32 %v365_v15, 16  ;;  %v414_v25 = vshrl.u32 %v1472_v6, 16  ;;  %v417_v26 = vshll.u32 %v1472_v6, 16  ;;  %v1491_v28 = vld [vmem:[%s1465_s8 + $0x20] sm:$0xf] }
  0x15   : > { %1304 = vmatmul.mubr.msk.bf16.vlgmr.msra.gmra.mxu1 %vm518_vm0, %v1210_v13  ;;  %v392_v24 = vor.u32 %v391_v18, %v388_v17  ;;  %v423_v27 = vshll.u32 %v367_v16, 16  ;;  %v397_v30 = vrot.slane %v395_v19, 5  ;;  %v428_v33 = vshrl.u32 %v1477_v11, 16  ;;  %v371_v34 = vld [vmem:[%s1465_s8 + $0x24] sm:$0x1] }
  0x16   : > { %v406_v31 = vor.u32 %v405_v21, %v402_v20  ;;  %v411_v32 = vrot.slane %v409_v22, 5  ;;  %1322 = vmatpush3.bf16.msra.mxu1 %v1364_v3  ;;  %v416_v36 = vrot.slane %v414_v25, 4  ;;  %v419_v37 = vrot.slane %v417_v26, 5  ;;  %v1505_v47 = vld [vmem:[%s1465_s8 + $0x28] sm:$0xf] }
  0x17   : > { %v393_v35 = vrot.slane %v392_v24, 4  ;;  %v425_v38 = vrot.slane %v423_v27, 5  ;;  %v430_v40 = vrot.slane %v428_v33, 4  ;;  %v431_v41 = vshll.u32 %v1477_v11, 16  ;;  %v1510_v52 = vld [vmem:[%s1465_s8 + $0x30] sm:$0xf] }
  0x18   : > { %v407_v39 = vrot.slane %v406_v31, 4  ;;  %v437_v42 = vshll.u32 %v369_v23, 16  ;;  %v420_v44 = vor.u32 %v419_v37, %v416_v36  ;;  %v442_v45 = vshrl.u32 %v1491_v28, 16  ;;  %v1513_v57 = vld [vmem:[%s1465_s8 + $0x38] sm:$0xf] }
  0x19   : > { %v398_v43 = vsel %vm1493_vm3, %v393_v35, %v397_v30  ;;  %v445_v46 = vshll.u32 %v1491_v28, 16  ;;  %v433_v49 = vrot.slane %v431_v41, 5  ;;  %v451_v51 = vshll.u32 %v371_v34, 16  ;;  %v373_v3 = vld [vmem:[%s1465_s8 + $0x2c] sm:$0x1] }
  0x1a   : > { %v412_v48 = vsel %vm1493_vm3, %v407_v39, %v411_v32  ;;  %v439_v50 = vrot.slane %v437_v42, 5  ;;  %v421_v53 = vrot.slane %v420_v44, 4  ;;  %v444_v54 = vrot.slane %v442_v45, 4  ;;  %v375_v10 = vld [vmem:[%s1465_s8 + $0x34] sm:$0x1] }
  0x1b   : > { %v447_v55 = vrot.slane %v445_v46, 5  ;;  %v1200_v56 = vcombine.low %v398_v43, %v412_v48  ;;  %v434_v58 = vor.u32 %v433_v49, %v430_v40  ;;  %v453_v59 = vrot.slane %v451_v51, 5  ;;  %v377_v19 = vld [vmem:[%s1465_s8 + $0x3c] sm:$0x1]  ;;  %v378_v30 = vld [vmem:[%s340_s12] sm:$0xf] }
  0x1c   : > { %v456_v60 = vshrl.u32 %v1505_v47, 16  ;;  %v459_v61 = vshll.u32 %v1505_v47, 16  ;;  %v426_v62 = vsel %vm1493_vm3, %v421_v53, %v425_v38  ;;  %v1211_v0 = vcombine.low %v1491_v28, %v1505_v47  ;;  %v379_v35 = vld [vmem:[%s340_s12 + $0x4] sm:$0x1] }
  0x1d   : > { %v448_v63 = vor.u32 %v447_v55, %v444_v54  ;;  %1293 = vmatprep.mubr.msk.bf16.mxu0 %vm518_vm0, %v1200_v56  ;;  %v470_v1 = vshrl.u32 %v1510_v52, 16  ;;  %v435_v4 = vrot.slane %v434_v58, 4  ;;  %v1231_v7 = vcombine.low %v412_v48, %v426_v62 }
  0x1e   : > { %v473_v8 = vshll.u32 %v1510_v52, 16  ;;  %v484_v9 = vshrl.u32 %v1513_v57, 16  ;;  %1307 = vmatprep.mubr.msk.bf16.mxu1 %vm518_vm0, %v1211_v0  ;;  %v487_v13 = vshll.u32 %v1513_v57, 16  ;;  %v1212_v14 = vcombine.low %v1510_v52, %v1513_v57 }
  0x1f   : > { %v449_v12 = vrot.slane %v448_v63, 4  ;;  %v458_v15 = vrot.slane %v456_v60, 4  ;;  %v440_v16 = vsel %vm1493_vm3, %v435_v4, %v439_v50  ;;  %v461_v17 = vrot.slane %v459_v61, 5 }
  0x20   : > { %v465_v18 = vshll.u32 %v373_v3, 16  ;;  %v472_v20 = vrot.slane %v470_v1, 4  ;;  %v1201_v21 = vcombine.low %v426_v62, %v440_v16  ;;  %1308 = vmatmul.mubr.msk.bf16.gmra.mxu1 %vm518_vm0, %v1212_v14  ;;  %v475_v22 = vrot.slane %v473_v8, 5 }
  0x21   : > { %v479_v23 = vshll.u32 %v375_v10, 16  ;;  %v454_v24 = vsel %vm1493_vm3, %v449_v12, %v453_v59  ;;  %v462_v25 = vor.u32 %v461_v17, %v458_v15  ;;  %v486_v27 = vrot.slane %v484_v9, 4  ;;  %1323 = vmatprep.mubr.msk.bf16.mxu1 %vm518_vm0, %v1231_v7 }
  0x22   : > { %v467_v26 = vrot.slane %v465_v18, 5  ;;  %1294 = vmatmul.mubr.msk.bf16.vlgmr.msra.gmra.mxu0 %vm518_vm0, %v1201_v21  ;;  %v476_v31 = vor.u32 %v475_v22, %v472_v20  ;;  %v489_v33 = vrot.slane %v487_v13, 5  ;;  %v493_v34 = vshll.u32 %v377_v19, 16  ;;  %v1240_v22 = vld [vmem:[%s1610_s3] ss:$0 sm:$0xff] }
  0x23   : > { %v481_v32 = vrot.slane %v479_v23, 5  ;;  %v1232_v36 = vcombine.low %v440_v16, %v454_v24  ;;  %1312 = vmatpush3.bf16.msra.mxu0 %v1453_v2  ;;  %v463_v37 = vrot.slane %v462_v25, 4  ;;  %v800_v41 = vshrl.u32 %v378_v30, 16 }
  0x24   : > { %v477_v38 = vrot.slane %v476_v31, 4  ;;  %v490_v39 = vor.u32 %v489_v33, %v486_v27  ;;  %v495_v40 = vrot.slane %v493_v34, 5  ;;  %v803_v43 = vshll.u32 %v378_v30, 16 }
  0x25   : > { %v468_v42 = vsel %vm1493_vm3, %v463_v37, %v467_v26  ;;  %v809_v44 = vshll.u32 %v379_v35, 16  ;;  %v802_v49 = vrot.slane %v800_v41, 4  ;;  %v1220_v53 = vcombine.low %v1469_v5, %v1472_v6 }
  0x26   : > { %v1202_v45 = vcombine.low %v454_v24, %v468_v42  ;;  %v482_v46 = vsel %vm1493_vm3, %v477_v38, %v481_v32  ;;  %v491_v48 = vrot.slane %v490_v39, 4  ;;  %v805_v50 = vrot.slane %v803_v43, 5 }
  0x27   : > { %v1233_v51 = vcombine.low %v468_v42, %v482_v46  ;;  %v811_v55 = vrot.slane %v809_v44, 5  ;;  %v1221_v61 = vcombine.low %v1477_v11, %v1491_v28  ;;  %v1222_v5 = vcombine.low %v1505_v47, %v1510_v52 }
  0x28   : > { %1297 = vmatprep.mubr.msk.bf16.mxu0 %vm518_vm0, %v1202_v45  ;;  %v496_v2 = vsel %vm1493_vm3, %v491_v48, %v495_v40  ;;  %1324 = vmatmul.mubr.msk.bf16.vlgmr.msra.gmra.mxu1 %vm518_vm0, %v1232_v36  ;;  %v806_v56 = vor.u32 %v805_v50, %v802_v49  ;;  %v1223_v6 = vcombine.low %v1513_v57, %v378_v30 }
  0x29   : > { %v1203_v54 = vcombine.low %v482_v46, %v496_v2  ;;  %1327 = vmatprep.mubr.msk.bf16.mxu1 %vm518_vm0, %v1233_v51 }
  0x2a   : > { %v807_v58 = vrot.slane %v806_v56, 4 }
  0x2b   : > { %1298 = vmatmul.mubr.msk.bf16.gmra.mxu0 %vm518_vm0, %v1203_v54 }
  0x2c   : > { %1313 = vmatprep.mubr.msk.bf16.mxu0 %vm518_vm0, %v1220_v53  ;;  %v812_v59 = vsel %vm1493_vm3, %v807_v58, %v811_v55 }
  0x2d   : > { %v1234_v60 = vcombine.low %v496_v2, %v812_v59 }
  0x30   : > { %1328 = vmatmul.mubr.msk.bf16.gmra.mxu1 %vm518_vm0, %v1234_v60 }
  0x33   : > { %1314 = vmatmul.mubr.msk.bf16.vlgmr.msra.gmra.mxu0 %vm518_vm0, %v1221_v61 }
  0x34   : > { %1317 = vmatprep.mubr.msk.bf16.mxu0 %vm518_vm0, %v1222_v5 }
  0x3b   : > { %1318 = vmatmul.mubr.msk.bf16.gmra.mxu0 %vm518_vm0, %v1223_v6 }
  0xd5   : > { %v1305_v62 = vpop.f32.mrf.mxu1 }
  0xd7   : > { %v668_v29 = vpop.f32.mrf.mxu1 }
  0xd9   : > { %v1306_v63 = vpop.f32.mrf.mxu1 }
  0xdb   : > { %v671_v0 = vpop.f32.mrf.mxu1 }
  0xe0   : > { %v1309_v1 = vpop.f32.mrf.mxu1 }
  0xe2   : > { %v1295_v3 = vpop.f32.mrf.mxu0  ;;  %v684_v11 = vpop.f32.mrf.mxu1 }
  0xe3   : > { %v677_v15 = vadd.f32 %v1305_v62, %v1295_v3 }
  0xe4   : > { %v565_v28 = vpop.f32.mrf.mxu0  ;;  %v1310_v4 = vpop.f32.mrf.mxu1 }
  0xe5   : > { %v669_v18 = vadd.f32 %v668_v29, %v565_v28 }
  0xe6   : > { %v1296_v47 = vpop.f32.mrf.mxu0  ;;  %v687_v52 = vpop.f32.mrf.mxu1 }
  0xe7   : > { %v680_v23 = vadd.f32 %v1306_v63, %v1296_v47 }
  0xe8   : > { %v568_v7 = vpop.f32.mrf.mxu0  ;;  %v1325_v8 = vpop.f32.mrf.mxu1 }
  0xe9   : > { %v672_v27 = vadd.f32 %v671_v0, %v568_v7 }
  0xea   : > { %v873_v10 = vpop.f32.mrf.mxu1 }
  0xeb   : > { %v1299_v9 = vpop.f32.mrf.mxu0 }
  0xec   : > { %v1326_v57 = vpop.f32.mrf.mxu1  ;;  %v693_v33 = vadd.f32 %v1309_v1, %v1299_v9 }
  0xed   : > { %v581_v12 = vpop.f32.mrf.mxu0 }
  0xee   : > { %v876_v17 = vpop.f32.mrf.mxu1  ;;  %v685_v40 = vadd.f32 %v684_v11, %v581_v12 }
  0xef   : > { %v1300_v13 = vpop.f32.mrf.mxu0 }
  0xf0   : > { %v1329_v21 = vpop.f32.mrf.mxu1  ;;  %v696_v46 = vadd.f32 %v1310_v4, %v1300_v13 }
  0xf1   : > { %v584_v14 = vpop.f32.mrf.mxu0 }
  0xf2   : > { %v889_v35 = vpop.f32.mrf.mxu1  ;;  %v688_v55 = vadd.f32 %v687_v52, %v584_v14 }
  0xf3   : > { %v1315_v16 = vpop.f32.mrf.mxu0 }
  0xf4   : > { %v793_v19 = vadd.f32 %v1315_v16, %v677_v15  ;;  %v1330_v49 = vpop.f32.mrf.mxu1 }
  0xf5   : > { %v760_v20 = vpop.f32.mrf.mxu0 }
  0xf6   : > { %v906_v24 = vadd.f32 %v1325_v8, %v793_v19  ;;  %v791_v25 = vadd.f32 %v760_v20, %v669_v18  ;;  %v892_v62 = vpop.f32.mrf.mxu1 }
  0xf7   : > { %v1316_v26 = vpop.f32.mrf.mxu0 }
  0xf8   : > { %v904_v30 = vadd.f32 %v873_v10, %v791_v25  ;;  %v794_v31 = vadd.f32 %v1316_v26, %v680_v23  ;;  %v921_v32 = vadd.f32 %v1240_v22, %v906_v24 }
  0xf9   : > { %v763_v34 = vpop.f32.mrf.mxu0 }
  0xfa   : > { %v907_v36 = vadd.f32 %v1326_v57, %v794_v31  ;;  %v792_v37 = vadd.f32 %v763_v34, %v672_v27  ;;  %v919_v38 = vadd.f32 %v1240_v22, %v904_v30  ;;  %v929_v39 = vmax.f32 %v921_v32, 0.0 }
  0xfb   : > { %v1319_v41 = vpop.f32.mrf.mxu0 }
  0xfc   : > { %v905_v42 = vadd.f32 %v876_v17, %v792_v37  ;;  %v797_v43 = vadd.f32 %v1319_v41, %v693_v33  ;;  %v927_v44 = vmax.f32 %v919_v38, 0.0  ;;  %v1261_v45 = vpack.c.bf16 %v929_v39, %v929_v39 }
  0xfd   : > { %v776_v48 = vpop.f32.mrf.mxu0  ;;  %v922_v50 = vadd.f32 %v1240_v22, %v907_v36 }
  0xfe   : > { %v795_v51 = vadd.f32 %v776_v48, %v685_v40  ;;  %v910_v2 = vadd.f32 %v1329_v21, %v797_v43  ;;  %976 = vxpose.xlu0.b32.start [1/8] (short) (narrow) %v927_v44, 32  ;;  %v1259_v53 = vpack.c.bf16 %v927_v44, %v927_v44  ;;  %v920_v54 = vadd.f32 %v1240_v22, %v905_v42 }
  0xff   : > { %970 = vst.msk [vmem:[%s1576_s22 + $0x8] sm:$0xf] %vm967_vm4, %v1261_v45  ;;  %v1320_v56 = vpop.f32.mrf.mxu0  ;;  %v930_v58 = vmax.f32 %v922_v50, 0.0 }
 0x100   : > { %968 = vst.msk [vmem:[%s1576_s22] sm:$0xf] %vm967_vm4, %v1259_v53  ;;  %v798_v59 = vadd.f32 %v1320_v56, %v696_v46  ;;  %v908_v60 = vadd.f32 %v889_v35, %v795_v51  ;;  %v928_v61 = vmax.f32 %v920_v54, 0.0  ;;  %v925_v5 = vadd.f32 %v1240_v22, %v910_v2 }
 0x101   : > { %v779_v6 = vpop.f32.mrf.mxu0  ;;  %v1262_v29 = vpack.c.bf16 %v930_v58, %v930_v58 }
 0x102   : > { %v796_v63 = vadd.f32 %v779_v6, %v688_v55  ;;  %v911_v0 = vadd.f32 %v1330_v49, %v798_v59  ;;  %977 = vxpose.xlu0.b32.cont [2/8] (short) (narrow) %v928_v61, 32  ;;  %v1260_v1 = vpack.c.bf16 %v928_v61, %v928_v61  ;;  %v923_v3 = vadd.f32 %v1240_v22, %v908_v60 }
 0x103   : > { %971 = vst.msk [vmem:[%s1576_s22 + $0xc] sm:$0xf] %vm967_vm4, %v1262_v29  ;;  %v933_v11 = vmax.f32 %v925_v5, 0.0 }
 0x104   : > { %969 = vst.msk [vmem:[%s1576_s22 + $0x4] sm:$0xf] %vm967_vm4, %v1260_v1  ;;  %v909_v28 = vadd.f32 %v892_v62, %v796_v63  ;;  %v931_v4 = vmax.f32 %v923_v3, 0.0  ;;  %v926_v47 = vadd.f32 %v1240_v22, %v911_v0 }
 0x105   : > { %v1265_v52 = vpack.c.bf16 %v933_v11, %v933_v11 }
 0x106   : > { %978 = vxpose.xlu0.b32.cont [3/8] (short) (narrow) %v929_v39, 32  ;;  %v1263_v7 = vpack.c.bf16 %v931_v4, %v931_v4  ;;  %v924_v8 = vadd.f32 %v1240_v22, %v909_v28  ;;  %v934_v9 = vmax.f32 %v926_v47, 0.0 }
 0x107   : > { %974 = vst.msk [vmem:[%s1576_s22 + $0x18] sm:$0xf] %vm967_vm4, %v1265_v52 }
 0x108   : > { %972 = vst.msk [vmem:[%s1576_s22 + $0x10] sm:$0xf] %vm967_vm4, %v1263_v7  ;;  %v932_v10 = vmax.f32 %v924_v8, 0.0  ;;  %v1266_v12 = vpack.c.bf16 %v934_v9, %v934_v9 }
 0x10a   : > { %979 = vxpose.xlu0.b32.cont [4/8] (short) (narrow) %v930_v58, 32  ;;  %v1264_v13 = vpack.c.bf16 %v932_v10, %v932_v10  ;;  %975 = vst.msk [vmem:[%s1576_s22 + $0x1c] sm:$0xf] %vm967_vm4, %v1266_v12 }
 0x10c   : > { %973 = vst.msk [vmem:[%s1576_s22 + $0x14] sm:$0xf] %vm967_vm4, %v1264_v13 }
 0x10e   : > { %980 = vxpose.xlu0.b32.cont [5/8] (short) (narrow) %v931_v4, 32 }
 0x112   : > { %981 = vxpose.xlu0.b32.cont [6/8] (short) (narrow) %v932_v10, 32 }
 0x116   : > { %982 = vxpose.xlu0.b32.cont [7/8] (short) (narrow) %v933_v11, 32 }
 0x11a   : > { %983 = vxpose.xlu0.b32.end [8/8] (short) (narrow) %v934_v9, 32 }
 0x17a   : > { %v992_v57 = vpop.trf.xlu0 }
 0x17b   : > { %v1267_v14 = vpack.c.bf16 %v992_v57, %v992_v57 }
 0x17d   : > { %1025 = vst.msk [vmem:[%s360_s26] sm:$0xf] %vm1024_vm5, %v1267_v14 }
 0x17e   : > { %v993_v15 = vpop.trf.xlu0 }
 0x17f   : > { %v1268_v16 = vpack.c.bf16 %v993_v15, %v993_v15 }
 0x181   : > { %1026 = vst.msk [vmem:[%s360_s26 + $0x4] sm:$0xf] %vm1024_vm5, %v1268_v16 }
 0x182   : > { %v994_v17 = vpop.trf.xlu0 }
 0x183   : > { %v1269_v18 = vpack.c.bf16 %v994_v17, %v994_v17 }
 0x185   : > { %1027 = vst.msk [vmem:[%s360_s26 + $0x8] sm:$0xf] %vm1024_vm5, %v1269_v18 }
 0x186   : > { %v995_v19 = vpop.trf.xlu0 }
 0x187   : > { %v1270_v20 = vpack.c.bf16 %v995_v19, %v995_v19 }
 0x189   : > { %1028 = vst.msk [vmem:[%s360_s26 + $0xc] sm:$0xf] %vm1024_vm5, %v1270_v20 }
 0x18a PF: > { %s16_s20 = sadd.s32 1, %s1392_s20   ;;  %s1615_s18 = smov %s1388_s19 }
 0x18b   : > { %p13_p5 = scmp.ge.s32.totalorder %s16_s20, 4   ;;  %s1616_s19 = smov %s1618_s21 }
 0x18d   :  { %15 = sbr.rel (!%p13_p5) target bundleno = 2 (0x2), region = 84 }

// kernel: _lambda_.6
= control target key start
LH: loop header
LB: loop body
LE: loop exit
PB: predicated region body
PF: predicated region fallthrough
CT: control target
= control target key end

     0   :  { %11 = vsyncpa [#allocation3], 0  ;;  %s2010_s0 = inlined_call_operand.vmem [shape: bf16[2,5,5,128], index: 0, kind: input, shape index: {}, may-alias: {0,1}]   ;;  %s2011_s1 = inlined_call_operand.vmem [shape: bf16[2,5,5,128], index: 1, kind: input, shape index: {}, may-alias: {0,1}]   ;;  %s2012_s2 = inlined_call_operand.vmem [shape: bf16[2,2,128,64], index: 2, kind: input, shape index: {}]   ;;  %s2013_s3 = inlined_call_operand.vmem [shape: f32[1,64], index: 3, kind: input, shape index: {}]   ;;  %s2014_s4 = inlined_call_operand.hbm [shape: bf16[2,16,64], index: 4, kind: output, shape index: {0}]   ;;  %s2015_s5 = inlined_call_operand.vmem [shape: bf16[2,64,16], index: 5, kind: output, shape index: {1}]  }
   0x1   :  { %13 = vsyncpa [#allocation3 + $0x1], 0  ;;  %s1670_s18 = smov 0   ;;  %s1672_s19 = smov 0  }
   0x2   :  { %s1674_s20 = smov 0   ;;  %s1676_s21 = smov 0  }
   0x3   :  { %s1678_s22 = smov 0   ;;  %s1680_s23 = smov 0  }
   0x4 LB: > { %s1222_s24 = sadd.s32 4294967295, %s1632_s23   ;;  %s1223_s25 = sadd.s32 4294967294, %s1632_s23   ;;  %s1632_s23 = sphi %s1680_s23, %s19_s23   ;;  %s1628_s22 = sphi %s1678_s22, %s2026_s22   ;;  %s1624_s21 = sphi %s1676_s21, %s2025_s21   ;;  %s1620_s20 = sphi %s1674_s20, %s2024_s20   ;;  %s1616_s19 = sphi %s1672_s19, %s2023_s19   ;;  %s1612_s18 = sphi %s1670_s18, %s2022_s18  }
   0x5   : > { %s31_s26 = sadd.s32 1, %s1628_s22  ;;  %s142_s27 = sadd.s32 1, %s1620_s20 }
   0x6   : > { %p33_p0 = scmp.ge.s32.totalorder %s31_s26, 2  ;;  %p152_p1 = scmp.ne.s32.totalorder %s1620_s20, %s1616_s19 }
   0x7   : > { %p153_p2 = scmp.eq.s32.totalorder %s1222_s24, 1  ;;  %p158_p3 = scmp.ne.s32.totalorder %s1616_s19, %s1612_s18 }
   0x8   : > { %s2028_s26 = smov (%p33_p0, %s31_s26), 0  ;;  %p159_p5 = scmp.eq.s32.totalorder %s1223_s25, 1 }
   0x9   : > { %p1710_p4 = por %p153_p2, %p152_p1  ;;  %s137_s29 = ssub.s32 %s1628_s22, %s2028_s26 }
   0xa   : > { %p1226_p6 = scmp.ge.s32.totalorder %s1632_s23, 1  ;;  %p140_p7 = scmp.eq.s32.totalorder %s137_s29, 0 }
   0xb   : > { %p1717_p8 = por %p159_p5, %p158_p3  ;;  %p247_p9 = scmp.lt.s32.totalorder %s1632_s23, 3 }
   0xc   : > { %s1723_s6 = scalar_select %p140_p7, %s1620_s20, %s142_s27  }
   0xd   : > { %p248_p10 = pnand %p1226_p6, %p247_p9 }
   0xe   : > { %p306_p11 = scmp.lt.s32.totalorder (!%p248_p10), %s1624_s21, 1  ;;  %s288_s12 = sand.u32 (!%p248_p10), 1, %s1616_s19  }
   0xf   : > { %251 = sbr.rel (%p248_p10) target bundleno = 442 (0x1ba), region = 36  ;;  %s1227_s13 = sshll.u32 (!%p248_p10), %s288_s12, 3 }
  0x10   : > { %s290_s14 = scalar_lea.vmem (!%p248_p10), [#allocation2], %s1227_s13  ;;  %s1341_s16 = sshll.u32 (!%p248_p10), %s1624_s21, 7 }
  0x11   : > { %s1953_s27 = scalar_lea.sflag (!%p248_p10), [#allocation3], %s288_s12  ;;  %s1637_s7 = smov (!%p248_p10), [#allocation2]  }
  0x14   : > { %v1521_v0 = vld [vmem:[%s2012_s2 + $0x78] sm:$0xff]   ;;  %v1634_v1 = vmov 0.0   ;;  %v1523_v3 = vld [vmem:[%s2012_s2 + $0x70] sm:$0xff]   ;;  %vm1635_vm0 = vmmov 0   ;;  %s1747_s15 = scalar_select %p306_p11, %s1624_s21, 1  ;;  %v1525_v5 = vld [vmem:[%s2012_s2 + $0x68] sm:$0xff]   ;;  %v369_v10 = vlaneseq }
  0x15   : > { %1378 = vmatprep.subr.bf16.mxu0 %v1634_v1  ;;  %1398 = vmatprep.subr.bf16.mxu1 %v1634_v1  ;;  %v1522_v2 = vld [vmem:[%s2012_s2 + $0x38] sm:$0xff]   ;;  %v1524_v4 = vld [vmem:[%s2012_s2 + $0x30] sm:$0xff]   ;;  %v1526_v6 = vld [vmem:[%s2012_s2 + $0x28] sm:$0xff]   ;;  %v1636_v14 = vmov 1983009808   ;;  %vm986_vm8 = vcmask 519168  }
  0x16   : > { %1379 = vmatpush3.bf16.msra.mxu0 %v1521_v0  ;;  %1394 = vmatprep.mubr.msk.bf16.mxu0 %vm1635_vm0, %v1634_v1  ;;  %v1527_v7 = vld [vmem:[%s2012_s2 + $0x60] sm:$0xff]   ;;  %s1458_s9 = smul.u32 20, %s1747_s15  ;;  %v1529_v9 = vld [vmem:[%s2012_s2 + $0x58] sm:$0xff]   ;;  %v1531_v12 = vld [vmem:[%s2012_s2 + $0x50] sm:$0xff]   ;;  %v367_v15 = vunpack.c.l.s4 %v1636_v14  ;;  %v370_v16 = vshrl.u32 %v369_v10, 7  ;;  %s1560_s21 = sshll.u32 %s1637_s7, 4  ;;  %s1561_s21 = int_to_ptr.vmem [resolvable:$false] %s1560_s21 }
  0x17   : > { %1399 = vmatpush3.bf16.msra.mxu1 %v1522_v2  ;;  %1380 = vmatprep.subr.bf16.mxu0 %v1634_v1  ;;  %v1528_v8 = vld [vmem:[%s2012_s2 + $0x20] sm:$0xff]   ;;  %v1530_v11 = vld [vmem:[%s2012_s2 + $0x18] sm:$0xff]   ;;  %v1532_v13 = vld [vmem:[%s2012_s2 + $0x10] sm:$0xff]   ;;  %vm398_vm1 = vsmask.f32 1280  ;;  %s1562_s8 = scalar_lea.vmem %s1561_s21, 256 }
  0x18   : > { %1400 = vmatprep.subr.bf16.mxu1 %v1634_v1  ;;  %1414 = vmatprep.mubr.msk.bf16.mxu1 %vm1635_vm0, %v1634_v1  ;;  %s313_s17 = scalar_lea.vmem %s2010_s0, %s1458_s9  ;;  %v1533_v18 = vld [vmem:[%s2012_s2 + $0x48] sm:$0xff]   ;;  %v368_v21 = vunpack.c.0.s8 %v367_v15  ;;  %vm399_vm2 = vsmask.f32 3336  ;;  %vm401_vm3 = vsmask.f32 5392  ;;  %v1535_v25 = vld [vmem:[%s2012_s2 + $0x40] sm:$0xff]  }
  0x19   : > { %v1786_v17 = vld [vmem:[%s313_s17] sm:$0x7]  ;;  %v1792_v19 = vld [vmem:[%s313_s17 + $0x4] sm:$0x7]  ;;  %v1794_v20 = vld [vmem:[%s313_s17 + $0x8] sm:$0x7] }
  0x1a   : > { %1381 = vmatpush3.bf16.msra.mxu0 %v1523_v3  ;;  %v1534_v22 = vld [vmem:[%s2012_s2 + $0x8] sm:$0xff]   ;;  %v1801_v24 = vsub.s32 %v368_v21, %v370_v16  ;;  %v1536_v30 = vld [vmem:[%s2012_s2] sm:$0xff]   ;;  %vm403_vm4 = vsmask.f32 7448  ;;  %v585_v31 = vcombine.low %v1786_v17, %v1792_v19  ;;  %vm400_vm5 = vmor %vm398_vm1, %vm399_vm2 }
  0x1b   : > { %1401 = vmatpush3.bf16.msra.mxu1 %v1524_v4  ;;  %1382 = vmatprep.subr.bf16.mxu0 %v1634_v1  ;;  %v1799_v23 = vld [vmem:[%s313_s17 + $0xc] sm:$0x7]  ;;  %s1825_s17 = sadd.s32 16, %s1458_s9  ;;  %vm1836_vm6 = vmor %vm400_vm5, %vm401_vm3  ;;  %v1550_v45 = vld [vmem:[%s2012_s2 + $0xd0] sm:$0xff]  }
  0x1c   : > { %1402 = vmatprep.subr.bf16.mxu1 %v1634_v1  ;;  %v372_v26 = vrot.slane %v1786_v17, %v1801_v24  ;;  %v380_v27 = vrot.slane %v1792_v19, %v1801_v24  ;;  %v388_v28 = vrot.slane %v1794_v20, %v1801_v24  ;;  %v396_v29 = vrot.slane %v1799_v23, %v1801_v24  ;;  %s328_s25 = scalar_lea.vmem %s2011_s1, %s1825_s17  ;;  %vm1846_vm7 = vmor %vm1836_vm6, %vm403_vm4  ;;  %s1086_s17 = sshll.u32 %s290_s14, 4  ;;  %s1951_s17 = int_to_ptr.vmem [resolvable:$true] %s1086_s17 }
  0x1d   : > { %v586_v32 = vcombine.low %v1794_v20, %v1799_v23  ;;  %v1841_v58 = vld [vmem:[%s328_s25] sm:$0x7]  ;;  %v593_v63 = vrot.slane %v585_v31, %v1801_v24  ;;  %s1949_s25 = scalar_lea.hbm %s2014_s4, %s1341_s16  ;;  %s1556_s29 = scalar_lea.vmem %s1951_s17, 128 }
  0x1e   : > { %1383 = vmatpush3.bf16.msra.mxu0 %v1525_v5  ;;  %v373_v33 = vcombine.high %v372_v26, %v372_v26  ;;  %v381_v34 = vcombine.high %v380_v27, %v380_v27  ;;  %v389_v35 = vcombine.high %v388_v28, %v388_v28  ;;  %v397_v36 = vcombine.high %v396_v29, %v396_v29  ;;  %p1557_p12 = scmp.ne.s32.totalorder %s1951_s17, %s1556_s29  ;;  %p1563_p1 = scmp.lt.s32.totalorder %s1951_s17, %s1561_s21 }
  0x1f   : > { %1403 = vmatpush3.bf16.msra.mxu1 %v1526_v6  ;;  %1384 = vmatprep.subr.bf16.mxu0 %v1634_v1  ;;  %v406_v37 = vshrl.u32 %v372_v26, 16  ;;  %v409_v38 = vshll.u32 %v372_v26, 16  ;;  %v420_v39 = vshrl.u32 %v380_v27, 16  ;;  %v423_v40 = vshll.u32 %v380_v27, 16  ;;  %p1564_p2 = scmp.lt.s32.totalorder %s1562_s8, %s1556_s29 }
  0x20   : > { %1404 = vmatprep.subr.bf16.mxu1 %v1634_v1  ;;  %v415_v41 = vshll.u32 %v373_v33, 16  ;;  %v429_v42 = vshll.u32 %v381_v34, 16  ;;  %v434_v43 = vshrl.u32 %v388_v28, 16  ;;  %v437_v44 = vshll.u32 %v388_v28, 16  ;;  %v1544_v33 = vld [vmem:[%s2012_s2 + $0xe8] sm:$0xff]   ;;  %p1558_p13 = pnand %p1557_p12, %p1710_p4 }
  0x21   : > { %v408_v46 = vrot.slane %v406_v37, 6  ;;  %v411_v47 = vrot.slane %v409_v38, 7  ;;  %v422_v48 = vrot.slane %v420_v39, 6  ;;  %v425_v49 = vrot.slane %v423_v40, 7  ;;  %v1541_v37 = vld [vmem:[%s2012_s2 + $0xb0] sm:$0xff]   ;;  %v1546_v38 = vld [vmem:[%s2012_s2 + $0xe0] sm:$0xff]   ;;  %p1565_p3 = por %p1564_p2, %p1563_p1 }
  0x22   : > { %1385 = vmatpush3.bf16.msra.mxu0 %v1527_v7  ;;  %v417_v50 = vrot.slane %v415_v41, 7  ;;  %v431_v51 = vrot.slane %v429_v42, 7  ;;  %v436_v52 = vrot.slane %v434_v43, 6  ;;  %v439_v53 = vrot.slane %v437_v44, 7  ;;  %v1543_v41 = vld [vmem:[%s2012_s2 + $0xa8] sm:$0xff]   ;;  %v1548_v42 = vld [vmem:[%s2012_s2 + $0xd8] sm:$0xff]   ;;  %p1559_p0 = pneg %p1558_p13 }
  0x23   : > { %1405 = vmatpush3.bf16.msra.mxu1 %v1528_v8  ;;  %1386 = vmatprep.subr.bf16.mxu0 %v1634_v1  ;;  %v412_v54 = vor.u32 %v411_v47, %v408_v46  ;;  %v426_v55 = vor.u32 %v425_v49, %v422_v48  ;;  %v443_v56 = vshll.u32 %v389_v35, 16  ;;  %v448_v57 = vshrl.u32 %v396_v29, 16  ;;  %v1545_v44 = vld [vmem:[%s2012_s2 + $0xa0] sm:$0xff]   ;;  %v1547_v48 = vld [vmem:[%s2012_s2 + $0x98] sm:$0xff]   ;;  %v1552_v49 = vld [vmem:[%s2012_s2 + $0xc8] sm:$0xff]  }
  0x24   : > { %1406 = vmatprep.subr.bf16.mxu1 %v1634_v1  ;;  %v440_v60 = vor.u32 %v439_v53, %v436_v52  ;;  %v451_v61 = vshll.u32 %v396_v29, 16  ;;  %v457_v62 = vshll.u32 %v397_v36, 16  ;;  %v600_v4 = vrot.slane %v586_v32, %v1801_v24  ;;  %v1539_v32 = vld [vmem:[%s2012_s2 + $0xb8] sm:$0xff]   ;;  %v1549_v52 = vld [vmem:[%s2012_s2 + $0x90] sm:$0xff]   ;;  %v1554_v53 = vld [vmem:[%s2012_s2 + $0xc0] sm:$0xff]   ;;  %p1566_p5 = pnand %p1565_p3, %p1559_p0 }
  0x25   : > { %v413_v0 = vrot.slane %v412_v54, 2  ;;  %v427_v2 = vrot.slane %v426_v55, 2  ;;  %v450_v3 = vrot.slane %v448_v57, 6  ;;  %v445_v6 = vrot.slane %v443_v56, 7  ;;  %v1551_v57 = vld [vmem:[%s2012_s2 + $0x88] sm:$0xff]  }
  0x26   : > { %1387 = vmatpush3.bf16.msra.mxu0 %v1529_v9  ;;  %v441_v5 = vrot.slane %v440_v60, 2  ;;  %v453_v7 = vrot.slane %v451_v61, 7  ;;  %v601_v15 = vcombine.low %v593_v63, %v600_v4  ;;  %v710_v54 = vcombine.low %v1792_v19, %v1794_v20  ;;  %v1553_v19 = vld [vmem:[%s2012_s2 + $0x80] sm:$0xff]  }
  0x27   : > { %1407 = vmatpush3.bf16.msra.mxu1 %v1530_v11  ;;  %1388 = vmatprep.subr.bf16.mxu0 %v1634_v1  ;;  %v418_v8 = vsel %vm1846_vm7, %v413_v0, %v417_v50  ;;  %v432_v9 = vsel %vm1846_vm7, %v427_v2, %v431_v51  ;;  %v459_v11 = vrot.slane %v457_v62, 7  ;;  %v711_v55 = vcombine.low %v1799_v23, %v1841_v58 }
  0x28   : > { %1408 = vmatprep.subr.bf16.mxu1 %v1634_v1  ;;  %v454_v10 = vor.u32 %v453_v7, %v450_v3  ;;  %v478_v14 = vcombine.low %v418_v8, %v432_v9  ;;  %v446_v16 = vsel %vm1846_vm7, %v441_v5, %v445_v6  ;;  %v718_v59 = vrot.slane %v710_v54, %v1801_v24 }
  0x29   : > { %v858_v46 = vcombine.low %v432_v9, %v446_v16  ;;  %v725_v60 = vrot.slane %v711_v55, %v1801_v24 }
  0x2a   : > { %1389 = vmatpush3.bf16.msra.mxu0 %v1531_v12  ;;  %v825_v12 = vrot.slane %v1841_v58, %v1801_v24  ;;  %v455_v17 = vrot.slane %v454_v10, 2  ;;  %v486_v27 = vrot.slane %v478_v14, %v1801_v24  ;;  %v1312_v10 = vld [vmem:[%s2013_s3] ss:$0 sm:$0xff] }
  0x2b   : > { %1409 = vmatpush3.bf16.msra.mxu1 %v1532_v13  ;;  %1390 = vmatprep.subr.bf16.mxu0 %v1634_v1  ;;  %v1540_v13 = vld [vmem:[%s2012_s2 + $0xf8] sm:$0xff]   ;;  %v866_v50 = vrot.slane %v858_v46, %v1801_v24  ;;  %v726_v20 = vcombine.low %v718_v59, %v725_v60 }
  0x2c   : > { %1410 = vmatprep.subr.bf16.mxu1 %v1634_v1  ;;  %v828_v21 = vshrl.u32 %v825_v12, 16  ;;  %v826_v29 = vcombine.high %v825_v12, %v825_v12 }
  0x2e   : > { %1391 = vmatpush3.bf16.msra.mxu0 %v1533_v18  ;;  %v460_v18 = vsel %vm1846_vm7, %v455_v17, %v459_v11  ;;  %v837_v36 = vshll.u32 %v826_v29, 16 }
  0x2f   : > { %1411 = vmatpush3.bf16.msra.mxu1 %v1534_v22  ;;  %1392 = vmatprep.subr.bf16.mxu0 %v1634_v1  ;;  %v831_v22 = vshll.u32 %v825_v12, 16  ;;  %v479_v26 = vcombine.low %v446_v16, %v460_v18 }
  0x30   : > { %1412 = vmatprep.subr.bf16.mxu1 %v1634_v1  ;;  %v839_v40 = vrot.slane %v837_v36, 7 }
  0x31   : > { %v493_v28 = vrot.slane %v479_v26, %v1801_v24  ;;  %v833_v31 = vrot.slane %v831_v22, 7 }
  0x32   : > { %1393 = vmatpush3.bf16.msra.mxu0 %v1535_v25  ;;  %v1542_v25 = vld [vmem:[%s2012_s2 + $0xf0] sm:$0xff]  }
  0x33   : > { %1413 = vmatpush3.bf16.msra.mxu1 %v1536_v30  ;;  %1418 = vmatprep.subr.bf16.mxu0 %v1634_v1  ;;  %v830_v30 = vrot.slane %v828_v21, 6  ;;  %v494_v34 = vcombine.low %v486_v27, %v493_v28 }
  0x34   : > { %1438 = vmatprep.subr.bf16.mxu1 %v1634_v1 }
  0x35   : > { %1395 = vmatmul.mubr.bf16.vlgmr.msra.gmra.mxu0 %v494_v34  ;;  %v834_v35 = vor.u32 %v833_v31, %v830_v30 }
  0x36   : > { %1415 = vmatmul.mubr.bf16.vlgmr.msra.gmra.mxu1 %v601_v15  ;;  %1419 = vmatpush3.bf16.msra.mxu0 %v1539_v32 }
  0x37   : > { %1439 = vmatpush3.bf16.msra.mxu1 %v1540_v13  ;;  %1454 = vmatprep.mubr.msk.bf16.mxu1 %vm1635_vm0, %v1634_v1  ;;  %v835_v39 = vrot.slane %v834_v35, 2 }
  0x38   : > { %1440 = vmatprep.subr.bf16.mxu1 %v1634_v1  ;;  %1420 = vmatprep.subr.bf16.mxu0 %v1634_v1 }
  0x39   : > { %1434 = vmatprep.mubr.msk.bf16.mxu0 %vm1635_vm0, %v1634_v1  ;;  %v840_v43 = vsel %vm1846_vm7, %v835_v39, %v839_v40 }
  0x3a   : > { %1421 = vmatpush3.bf16.msra.mxu0 %v1541_v37  ;;  %v859_v47 = vcombine.low %v460_v18, %v840_v43 }
  0x3b   : > { %1441 = vmatpush3.bf16.msra.mxu1 %v1542_v25  ;;  %1422 = vmatprep.subr.bf16.mxu0 %v1634_v1 }
  0x3c   : > { %1442 = vmatprep.subr.bf16.mxu1 %v1634_v1  ;;  %v873_v51 = vrot.slane %v859_v47, %v1801_v24 }
  0x3e   : > { %1423 = vmatpush3.bf16.msra.mxu0 %v1543_v41  ;;  %v874_v56 = vcombine.low %v866_v50, %v873_v51 }
  0x3f   : > { %1443 = vmatpush3.bf16.msra.mxu1 %v1544_v33  ;;  %1424 = vmatprep.subr.bf16.mxu0 %v1634_v1 }
  0x40   : > { %1444 = vmatprep.subr.bf16.mxu1 %v1634_v1 }
  0x42   : > { %1425 = vmatpush3.bf16.msra.mxu0 %v1545_v44 }
  0x43   : > { %1445 = vmatpush3.bf16.msra.mxu1 %v1546_v38  ;;  %1426 = vmatprep.subr.bf16.mxu0 %v1634_v1 }
  0x44   : > { %1446 = vmatprep.subr.bf16.mxu1 %v1634_v1 }
  0x46   : > { %1427 = vmatpush3.bf16.msra.mxu0 %v1547_v48 }
  0x47   : > { %1447 = vmatpush3.bf16.msra.mxu1 %v1548_v42  ;;  %1428 = vmatprep.subr.bf16.mxu0 %v1634_v1 }
  0x48   : > { %1448 = vmatprep.subr.bf16.mxu1 %v1634_v1 }
  0x4a   : > { %1429 = vmatpush3.bf16.msra.mxu0 %v1549_v52 }
  0x4b   : > { %1449 = vmatpush3.bf16.msra.mxu1 %v1550_v45  ;;  %1430 = vmatprep.subr.bf16.mxu0 %v1634_v1 }
  0x4c   : > { %1450 = vmatprep.subr.bf16.mxu1 %v1634_v1 }
  0x4e   : > { %1431 = vmatpush3.bf16.msra.mxu0 %v1551_v57 }
  0x4f   : > { %1451 = vmatpush3.bf16.msra.mxu1 %v1552_v49  ;;  %1432 = vmatprep.subr.bf16.mxu0 %v1634_v1 }
  0x50   : > { %1452 = vmatprep.subr.bf16.mxu1 %v1634_v1 }
  0x52   : > { %1433 = vmatpush3.bf16.msra.mxu0 %v1553_v19 }
  0x53   : > { %1453 = vmatpush3.bf16.msra.mxu1 %v1554_v53 }
  0x55   : > { %1435 = vmatmul.mubr.bf16.vlgmr.msra.gmra.mxu0 %v726_v20 }
  0x56   : > { %1455 = vmatmul.mubr.bf16.vlgmr.msra.gmra.mxu1 %v874_v56 }
  0xf5   : > { %v578_v63 = vpop.f32.mrf.mxu0 }
  0xf6   : > { %v685_v23 = vpop.f32.mrf.mxu1 }
  0xf7   : > { %v1396_v0 = vpop.f32.mrf.mxu0  ;;  %v686_v7 = vadd.f32 %v685_v23, %v578_v63 }
  0xf8   : > { %v1416_v58 = vpop.f32.mrf.mxu1 }
  0xf9   : > { %v581_v2 = vpop.f32.mrf.mxu0 }
  0xfa   : > { %v688_v61 = vpop.f32.mrf.mxu1 }
  0xfb   : > { %v1397_v24 = vpop.f32.mrf.mxu0  ;;  %v689_v11 = vadd.f32 %v688_v61, %v581_v2 }
  0xfc   : > { %v1417_v62 = vpop.f32.mrf.mxu1 }
 0x115   : > { %v810_v8 = vpop.f32.mrf.mxu0 }
 0x116   : > { %v958_v3 = vpop.f32.mrf.mxu1  ;;  %v817_v9 = vadd.f32 %v810_v8, %v686_v7 }
 0x117   : > { %v1436_v1 = vpop.f32.mrf.mxu0 }
 0x118   : > { %v1456_v4 = vpop.f32.mrf.mxu1  ;;  %v965_v12 = vadd.f32 %v958_v3, %v817_v9 }
 0x119   : > { %v813_v13 = vpop.f32.mrf.mxu0 }
 0x11a   : > { %v961_v5 = vpop.f32.mrf.mxu1  ;;  %v818_v14 = vadd.f32 %v813_v13, %v689_v11  ;;  %v974_v15 = vadd.f32 %v1312_v10, %v965_v12 }
 0x11b   : > { %v1437_v16 = vpop.f32.mrf.mxu0 }
 0x11c   : > { %v1457_v6 = vpop.f32.mrf.mxu1  ;;  %v966_v17 = vadd.f32 %v961_v5, %v818_v14  ;;  %v976_v18 = vmax.f32 %v974_v15, 0.0 }
 0x11e   : > { %989 = vxpose.xlu0.b32.start [1/2] (short) (narrow) %v976_v18, 64  ;;  %v1331_v21 = vpack.c.bf16 %v976_v18, %v976_v18  ;;  %v975_v22 = vadd.f32 %v1312_v10, %v966_v17 }
 0x120   : > { %987 = vst.msk [vmem:[%s290_s14] sm:$0xf] %vm986_vm8, %v1331_v21  ;;  %v977_v25 = vmax.f32 %v975_v22, 0.0 }
 0x122   : > { %990 = vxpose.xlu0.b32.end [2/2] (short) (narrow) %v977_v25, 64  ;;  %v1332_v26 = vpack.c.bf16 %v977_v25, %v977_v25 }
 0x124   : > { %988 = vst.msk [vmem:[%s290_s14 + $0x4] sm:$0xf] %vm986_vm8, %v1332_v26 }
 0x125   : > { %1569 = shalt.err (!%p1566_p5)
}
 0x126   : > { %s1570_s10 = scalar_lea.hbm %s1949_s25, 128  ;;  %s1574_s13 = scalar_lea.hbm %s2014_s4, 256 }
 0x127   : > { %p1571_p6 = scmp.ne.s32.totalorder %s1949_s25, %s1570_s10  ;;  %p1575_p10 = scmp.lt.s32.totalorder %s1949_s25, %s2014_s4 }
 0x128   : > { %p1576_p11 = scmp.lt.s32.totalorder %s1574_s13, %s1570_s10 }
 0x129   : > { %p1572_p7 = pnand %p1571_p6, %p1710_p4 }
 0x12a   : > { %p1577_p12 = por %p1576_p11, %p1575_p10 }
 0x12b   : > { %p1573_p9 = pneg %p1572_p7 }
 0x12d   : > { %p1578_p13 = pnand %p1577_p12, %p1573_p9 }
 0x12f   : > { %1581 = shalt.err (!%p1578_p13)
}
 0x130   : > { %s1638_s9 = smov 64   ;;  %s1639_s24 = smov 4   ;;  %vm1053_vm9 = vcmask 125952  }
 0x131   : > { %1460 = dma.vmem_to_hbm [thread:$0]  (%p1710_p4), %s1951_s17, 128, %s1949_s25, %s1953_s27, %s1638_s9, %s1638_s9, %s1639_s24  }
 0x132   : > { %s1330_s29 = sshll.u32 %s1747_s15, 5 }
 0x133   : > { %s339_s8 = scalar_lea.vmem %s2015_s5, %s1330_s29 }
 0x19a   : > { %v1005_v27 = vpop.trf.xlu0 }
 0x19b   : > { %v1333_v28 = vpack.c.bf16 %v1005_v27, %v1005_v27 }
 0x19d   : > { %1054 = vst.msk [vmem:[%s339_s8] sm:$0xf] %vm1053_vm9, %v1333_v28 }
 0x19e   : > { %v1006_v29 = vpop.trf.xlu0 }
 0x19f   : > { %v1334_v30 = vpack.c.bf16 %v1006_v29, %v1006_v29 }
 0x1a1   : > { %1055 = vst.msk [vmem:[%s339_s8 + $0x4] sm:$0xf] %vm1053_vm9, %v1334_v30 }
 0x1a2   : > { %v1007_v31 = vpop.trf.xlu0 }
 0x1a3   : > { %v1335_v32 = vpack.c.bf16 %v1007_v31, %v1007_v31 }
 0x1a5   : > { %1056 = vst.msk [vmem:[%s339_s8 + $0x8] sm:$0xf] %vm1053_vm9, %v1335_v32 }
 0x1a6   : > { %v1008_v33 = vpop.trf.xlu0 }
 0x1a7   : > { %v1336_v34 = vpack.c.bf16 %v1008_v33, %v1008_v33 }
 0x1a9   : > { %1057 = vst.msk [vmem:[%s339_s8 + $0xc] sm:$0xf] %vm1053_vm9, %v1336_v34 }
 0x1aa   : > { %v1009_v35 = vpop.trf.xlu0 }
 0x1ab   : > { %v1337_v36 = vpack.c.bf16 %v1009_v35, %v1009_v35 }
 0x1ad   : > { %1058 = vst.msk [vmem:[%s339_s8 + $0x10] sm:$0xf] %vm1053_vm9, %v1337_v36 }
 0x1ae   : > { %v1010_v37 = vpop.trf.xlu0 }
 0x1af   : > { %v1338_v38 = vpack.c.bf16 %v1010_v37, %v1010_v37 }
 0x1b1   : > { %1059 = vst.msk [vmem:[%s339_s8 + $0x14] sm:$0xf] %vm1053_vm9, %v1338_v38 }
 0x1b2   : > { %v1011_v39 = vpop.trf.xlu0 }
 0x1b3   : > { %v1339_v40 = vpack.c.bf16 %v1011_v39, %v1011_v39 }
 0x1b5   : > { %1060 = vst.msk [vmem:[%s339_s8 + $0x18] sm:$0xf] %vm1053_vm9, %v1339_v40 }
 0x1b6   : > { %v1012_v41 = vpop.trf.xlu0 }
 0x1b7   : > { %v1340_v42 = vpack.c.bf16 %v1012_v41, %v1012_v41 }
 0x1b9   : > { %1061 = vst.msk [vmem:[%s339_s8 + $0x1c] sm:$0xf] %vm1053_vm9, %v1340_v42 }
 0x1ba PF: > { %p1467_p4 = scmp.ge.s32.totalorder %s1632_s23, 2  ;;  %s1104_s28 = sand.u32 1, %s1612_s18  }
 0x1bb   : > { %s1105_s15 = scalar_lea.sflag [#allocation3], %s1104_s28 }
 0x1bc   : > { %p1463_p0 = pnand %p1467_p4, %p1717_p8 }
 0x1be   : > { %p1464_p1 = pneg %p1463_p0 }
 0x1c0   : > { %1607 = dma.done.wait (%p1464_p1), %s1105_s15, 128  }
 0x1c1   : > { %1609 = vsyncadd (%p1464_p1), %s1105_s15, 4294967168  ;;  %s19_s23 = sadd.s32 1, %s1632_s23   ;;  %s2022_s18 = smov %s1616_s19 }
 0x1c2   : > { %p16_p2 = scmp.ge.s32.totalorder %s19_s23, 4   ;;  %s2023_s19 = smov %s1620_s20 }
 0x1c3   : > { %s2024_s20 = smov %s1723_s6  ;;  %s2025_s21 = smov %s1628_s22 }
 0x1c4   : > { %s2026_s22 = smov %s2028_s26  ;;  %18 = sbr.rel (!%p16_p2) target bundleno = 4 (0x4), region = 89 }
 0x1c9   :  { %1121 = vsyncpa [#allocation3], 1 }
 0x1ca   :  { %1123 = vsyncpa [#allocation3 + $0x1], 1 }

// kernel: _lambda_.5
= control target key start
LH: loop header
LB: loop body
LE: loop exit
PB: predicated region body
PF: predicated region fallthrough
CT: control target
= control target key end

     0   :  { %s987_s15 = smov 0   ;;  %s989_s16 = smov 0   ;;  %s1311_s0 = inlined_call_operand.vmem [shape: f32[16,1], index: 0, kind: input, shape index: {}]   ;;  %s1312_s1 = inlined_call_operand.vmem [shape: f32[16,1], index: 1, kind: input, shape index: {}]   ;;  %s1313_s2 = inlined_call_operand.vmem [shape: f32[2,1,128], index: 2, kind: input, shape index: {}]   ;;  %s1314_s3 = inlined_call_operand.vmem [shape: f32[2,1,128], index: 3, kind: input, shape index: {}]   ;;  %s1315_s4 = inlined_call_operand.vmem [shape: bf16[2,32,128], index: 4, kind: output, shape index: {}]  }
   0x1   :  { %s991_s17 = smov 0  }
   0x2 LB: > { %s26_s18 = sadd.s32 1, %s949_s16  ;;  %p823_p0 = scmp.ge.s32.totalorder %s953_s17, 1  ;;  %s953_s17 = sphi %s991_s17, %s14_s17   ;;  %s949_s16 = sphi %s989_s16, %s1323_s16   ;;  %s945_s15 = sphi %s987_s15, %s1322_s15  }
   0x3   : > { %p28_p1 = scmp.ge.s32.totalorder %s26_s18, 2  ;;  %p192_p2 = scmp.lt.s32.totalorder %s953_s17, 3 }
   0x5   : > { %s1325_s18 = smov (%p28_p1, %s26_s18), 0  ;;  %p193_p3 = pnand %p823_p0, %p192_p2 }
   0x6   : > { %p228_p4 = scmp.lt.s32.totalorder (!%p193_p3), %s945_s15, 1 }
   0x7   : > { %196 = sbr.rel (%p193_p3) target bundleno = 281 (0x119), region = 36 }
   0xc   : > { %v250_v0 = vld [vmem:[%s1312_s1] sm:$0xff]  ;;  %v955_v2 = vmov 0   ;;  %v251_v3 = vld [vmem:[%s1312_s1 + $0x8] sm:$0xff]  ;;  %s1327_s15 = smov (!%p228_p4, %s945_s15), 1  ;;  %v956_v42 = vmov 683565275  }
   0xd   : > { %v248_v1 = vld [vmem:[%s1311_s0] sm:$0xff]  ;;  %914 = vset.pattern.permute.xlu1 %v955_v2  ;;  %913 = vset.pattern.permute.xlu0 %v955_v2  ;;  %v249_v4 = vld [vmem:[%s1311_s0 + $0x8] sm:$0xff]  ;;  %s233_s29 = scalar_lea.vmem %s1313_s2, %s1327_s15  ;;  %s239_s6 = scalar_lea.vmem %s1314_s3, %s1327_s15  ;;  %v957_v44 = vmov 2475754826   ;;  %v958_v46 = vmov 2131351028  }
   0xe   : > { %273 = vperm.xlu1 %914, %v250_v0   ;;  %261 = vperm.xlu0 %913, %v248_v1   ;;  %v826_v5 = vld [vmem:[%s233_s29] ss:$0 sm:$0xff]  ;;  %v959_v48 = vmov 2102212464   ;;  %v960_v50 = vmov 920167782  }
   0xf   : > { %v835_v6 = vld [vmem:[%s239_s6] ss:$0 sm:$0xff]  ;;  %v961_v57 = vmov 1326507024   ;;  %s850_s7 = sshll.u32 %s1327_s15, 4 }
  0x10   : > { %s1272_s10 = scalar_lea.vmem %s1315_s4, %s850_s7 }
  0x12   : > { %278 = vperm.xlu1 %914, %v251_v3   ;;  %266 = vperm.xlu0 %913, %v249_v4  }
  0x89   : > { %v274_v7 = vpop.permute.xlu1 %273  ;;  %v262_v8 = vpop.permute.xlu0 %261 }
  0x8a   : > { %v269_v9 = vmul.f32 %v826_v5, %v262_v8  ;;  %v498_v10 = vmul.f32 %v835_v6, %v262_v8 }
  0x8c   : > { %v1027_v11 = vadd.f32 %v274_v7, %v269_v9  ;;  %v1029_v13 = vadd.f32 %v498_v10, %v274_v7 }
  0x8d   : > { %v267_v12 = vpop.permute.xlu0 %266  ;;  %v1033_v17 = vpop.permute.xlu1 %278 }
  0x8e   : > { %v270_v14 = vmul.f32 %v826_v5, %v267_v12  ;;  %v283_v15 = vand.u32 2147483647, %v1027_v11  ;;  %v286_v16 = vand.u32 2139095040, %v1027_v11  ;;  %v505_v21 = vand.u32 2139095040, %v1029_v13 }
  0x8f   : > { %v499_v36 = vmul.f32 %v835_v6, %v267_v12  ;;  %v502_v40 = vand.u32 2147483647, %v1029_v13 }
  0x90   : > { %v1036_v18 = vadd.f32 %v1033_v17, %v270_v14  ;;  %v287_v19 = vshrl.u32 %v286_v16, 23  ;;  %v290_v20 = vand.u32 8388607, %v283_v15  ;;  %v506_v25 = vshrl.u32 %v505_v21, 23 }
  0x91   : > { %v1076_v21 = vand.u32 8388607, %v502_v40 }
  0x92   : > { %v827_v22 = vadd.s32 4294967169, %v287_v19  ;;  %v387_v23 = vand.u32 2147483647, %v1036_v18  ;;  %v390_v24 = vand.u32 2139095040, %v1036_v18  ;;  %v291_v27 = vor.u32 8388608, %v290_v20 }
  0x93   : > { %v836_v30 = vadd.s32 4294967169, %v506_v25  ;;  %v1072_v20 = vadd.f32 %v499_v36, %v1033_v17 }
  0x94   : > { %v293_v26 = vadd.s32 1, %v827_v22  ;;  %v391_v28 = vshrl.u32 %v390_v24, 23  ;;  %v1045_v29 = vand.u32 8388607, %v387_v23  ;;  %v1047_v37 = vshll.u32 %v291_v27, 8 }
  0x95   : > { %v512_v33 = vadd.s32 1, %v836_v30 }
  0x96   : > { %vm294_vm0 = vcmp.gt.s32.totalorder %v293_v26, 0  ;;  %v831_v32 = vadd.s32 4294967169, %v391_v28  ;;  %v395_v38 = vor.u32 8388608, %v1045_v29 }
  0x97   : > { %v295_v31 = vsel %vm294_vm0, %v293_v26, 0  ;;  %vm513_vm1 = vcmp.gt.s32.totalorder %v512_v33, 0 }
  0x98   : > { %v296_v34 = vshrl.u32 %v295_v31, 5  ;;  %v297_v35 = vand.u32 31, %v295_v31  ;;  %v397_v39 = vadd.s32 1, %v831_v32  ;;  %v435_v29 = vshll.u32 %v395_v38, 8 }
  0x99   : > { %v514_v17 = vsel %vm513_vm1, %v512_v33, 0 }
  0x9a   : > { %v298_v41 = vsub.s32 32, %v297_v35  ;;  %v300_v43 = vshll.u32 %v956_v42, %v297_v35  ;;  %v303_v45 = vshll.u32 %v957_v44, %v297_v35  ;;  %v306_v47 = vshll.u32 %v958_v46, %v297_v35 }
  0x9b   : > { %v309_v49 = vshll.u32 %v959_v48, %v297_v35  ;;  %v312_v51 = vshll.u32 %v960_v50, %v297_v35  ;;  %vm315_vm2 = vcmp.lt.s32.totalorder %v296_v34, 1  ;;  %vm316_vm3 = vcmp.lt.s32.totalorder %v296_v34, 2 }
  0x9c   : > { %v301_v52 = vshrl.u32 %v957_v44, %v298_v41  ;;  %v304_v53 = vshrl.u32 %v958_v46, %v298_v41  ;;  %v307_v54 = vshrl.u32 %v959_v48, %v298_v41  ;;  %v299_v55 = vshrl.u32 %v956_v42, %v298_v41 }
  0x9d   : > { %v310_v56 = vshrl.u32 %v960_v50, %v298_v41  ;;  %v313_v58 = vshrl.u32 %v961_v57, %v298_v41  ;;  %vm317_vm4 = vcmp.lt.s32.totalorder %v296_v34, 3  ;;  %vm398_vm5 = vcmp.gt.s32.totalorder %v397_v39, 0 }
  0x9e   : > { %v302_v59 = vor.u32 %v301_v52, %v300_v43  ;;  %v305_v60 = vor.u32 %v304_v53, %v303_v45  ;;  %v308_v61 = vor.u32 %v307_v54, %v306_v47  ;;  %vm318_vm6 = vcmp.lt.s32.totalorder %v296_v34, 4 }
  0x9f   : > { %v311_v62 = vor.u32 %v310_v56, %v309_v49  ;;  %v314_v63 = vor.u32 %v313_v58, %v312_v51  ;;  %v399_v0 = vsel %vm398_vm5, %v397_v39, 0  ;;  %vm1188_vm5 = vcmp.le.f32.partialorder %v283_v15, 0.7853982 }
  0xa0   : > { %v319_v1 = vsel %vm315_vm2, %v299_v55, %v302_v59  ;;  %v320_v2 = vsel %vm318_vm6, %v308_v61, 2102212464  ;;  %v323_v3 = vsel %vm315_vm2, %v302_v59, %v305_v60  ;;  %v327_v4 = vsel %vm315_vm2, %v305_v60, %v308_v61 }
  0xa1   : > { %v321_v5 = vsel %vm317_vm4, %v305_v60, %v320_v2  ;;  %v324_v6 = vsel %vm318_vm6, %v311_v62, 920167782  ;;  %v328_v7 = vsel %vm318_vm6, %v314_v63, 1326507024  ;;  %v400_v8 = vshrl.u32 %v399_v0, 5 }
  0xa2   : > { %v322_v9 = vsel %vm316_vm3, %v319_v1, %v321_v5  ;;  %v325_v10 = vsel %vm317_vm4, %v308_v61, %v324_v6  ;;  %v329_v12 = vsel %vm317_vm4, %v311_v62, %v328_v7  ;;  %v401_v14 = vand.u32 31, %v399_v0 }
  0xa3   : > { %v326_v16 = vsel %vm316_vm3, %v323_v3, %v325_v10  ;;  %v330_v19 = vsel %vm316_vm3, %v327_v4, %v329_v12  ;;  %v338_v27 = vmul.u32 %v1047_v37, %v322_v9  ;;  %vm419_vm7 = vcmp.lt.s32.totalorder %v400_v8, 1 }
  0xa4   : > { %v1079_v22 = vmul.u32.u64.low %v1047_v37, %v330_v19  ;;  %v1080_v24 = vmul.u32.u64.high %v1047_v37, %v330_v19, %v1079_v22  ;;  %v1083_v25 = vmul.u32.u64.low %v1047_v37, %v326_v16  ;;  %v1084_v26 = vmul.u32.u64.high %v1047_v37, %v326_v16, %v1083_v25 }
  0xa5   : > { %v402_v28 = vsub.s32 32, %v401_v14  ;;  %v404_v30 = vshll.u32 %v956_v42, %v401_v14  ;;  %v407_v31 = vshll.u32 %v957_v44, %v401_v14  ;;  %v410_v32 = vshll.u32 %v958_v46, %v401_v14 }
  0xa6   : > { %v413_v39 = vshll.u32 %v959_v48, %v401_v14  ;;  %vm340_vm8 = vc.u32 %v1080_v24, %v1083_v25  ;;  %v341_v33 = vadd.s32 1, %v1084_v26  ;;  %v416_v38 = vshll.u32 %v960_v50, %v401_v14 }
  0xa7   : > { %v405_v34 = vshrl.u32 %v957_v44, %v402_v28  ;;  %v408_v35 = vshrl.u32 %v958_v46, %v402_v28  ;;  %v411_v36 = vshrl.u32 %v959_v48, %v402_v28  ;;  %v414_v37 = vshrl.u32 %v960_v50, %v402_v28 }
  0xa8   : > { %v417_v47 = vshrl.u32 %v961_v57, %v402_v28  ;;  %v342_v49 = vsel %vm340_vm8, %v341_v33, %v1084_v26  ;;  %vm420_vm9 = vcmp.lt.s32.totalorder %v400_v8, 2  ;;  %vm422_vm10 = vcmp.lt.s32.totalorder %v400_v8, 4 }
  0xa9   : > { %v406_v41 = vor.u32 %v405_v34, %v404_v30  ;;  %v409_v43 = vor.u32 %v408_v35, %v407_v31  ;;  %v412_v45 = vor.u32 %v411_v36, %v410_v32  ;;  %v415_v51 = vor.u32 %v414_v37, %v413_v39 }
  0xaa   : > { %v343_v52 = vadd.s32 %v342_v49, %v338_v27  ;;  %v403_v53 = vshrl.u32 %v956_v42, %v402_v28  ;;  %v418_v54 = vor.u32 %v417_v47, %v416_v38  ;;  %vm421_vm11 = vcmp.lt.s32.totalorder %v400_v8, 3 }
  0xab   : > { %v424_v55 = vsel %vm422_vm10, %v412_v45, 2102212464  ;;  %v427_v56 = vsel %vm419_vm7, %v406_v41, %v409_v43  ;;  %v428_v58 = vsel %vm422_vm10, %v415_v51, 920167782  ;;  %v431_v59 = vsel %vm419_vm7, %v409_v43, %v412_v45 }
  0xac   : > { %v344_v60 = vadd.s32 536870912, %v343_v52  ;;  %v423_v61 = vsel %vm419_vm7, %v403_v53, %v406_v41  ;;  %v429_v62 = vsel %vm421_vm11, %v412_v45, %v428_v58  ;;  %v432_v63 = vsel %vm422_vm10, %v418_v54, 1326507024 }
  0xad   : > { %v425_v0 = vsel %vm421_vm11, %v409_v43, %v424_v55  ;;  %v430_v1 = vsel %vm420_vm9, %v427_v56, %v429_v62  ;;  %v433_v2 = vsel %vm421_vm11, %v415_v51, %v432_v63  ;;  %v516_v3 = vand.u32 31, %v514_v17 }
  0xae   : > { %v1108_v4 = vshrl.u32 %v344_v60, 30  ;;  %v434_v5 = vsel %vm420_vm9, %v431_v59, %v433_v2  ;;  %v1111_v6 = vmul.u32.u64.low %v435_v29, %v430_v1  ;;  %v1112_v7 = vmul.u32.u64.high %v435_v29, %v430_v1, %v1111_v6 }
  0xaf   : > { %v1115_v9 = vmul.u32.u64.low %v435_v29, %v434_v5  ;;  %v1116_v10 = vmul.u32.u64.high %v435_v29, %v434_v5, %v1115_v9  ;;  %v517_v12 = vsub.s32 32, %v516_v3  ;;  %v426_v16 = vsel %vm420_vm9, %v423_v61, %v425_v0 }
  0xb0   : > { %v346_v14 = vshll.u32 %v1108_v4, 30  ;;  %v445_v22 = vadd.s32 1, %v1112_v7  ;;  %v510_v26 = vor.u32 8388608, %v1076_v21  ;;  %v609_v27 = vand.u32 2139095040, %v1072_v20 }
  0xb1   : > { %v442_v28 = vmul.u32 %v435_v29, %v426_v16  ;;  %vm444_vm12 = vc.u32 %v1116_v10, %v1111_v6  ;;  %v1127_v30 = vshrl.u32 %v514_v17, 5  ;;  %v520_v31 = vshrl.u32 %v957_v44, %v517_v12 }
  0xb2   : > { %v1120_v19 = vsub.s32 %v343_v52, %v346_v14  ;;  %v446_v8 = vsel %vm444_vm12, %v445_v22, %v1112_v7  ;;  %v523_v34 = vshrl.u32 %v958_v46, %v517_v12  ;;  %v526_v35 = vshrl.u32 %v959_v48, %v517_v12 }
  0xb3   : > { %v447_v36 = vadd.s32 %v446_v8, %v442_v28  ;;  %v519_v21 = vshll.u32 %v956_v42, %v516_v3  ;;  %v528_v29 = vshll.u32 %v959_v48, %v516_v3  ;;  %v529_v39 = vshrl.u32 %v960_v50, %v517_v12 }
  0xb4   : > { %v349_v32 = vsub.s32 0, %v1120_v19  ;;  %v522_v33 = vshll.u32 %v957_v44, %v516_v3  ;;  %v525_v37 = vshll.u32 %v958_v46, %v516_v3  ;;  %v532_v38 = vshrl.u32 %v961_v57, %v517_v12 }
  0xb5   : > { %v448_v41 = vadd.s32 536870912, %v447_v36  ;;  %v530_v43 = vor.u32 %v529_v39, %v528_v29  ;;  %v531_v45 = vshll.u32 %v960_v50, %v516_v3  ;;  %v521_v49 = vor.u32 %v520_v31, %v519_v21 }
  0xb6   : > { %v828_v17 = vmin.u32 %v349_v32, %v1120_v19  ;;  %v524_v51 = vor.u32 %v523_v34, %v522_v33  ;;  %v527_v52 = vor.u32 %v526_v35, %v525_v37  ;;  %vm537_vm13 = vcmp.lt.s32.totalorder %v1127_v30, 4 }
  0xb7   : > { %v1142_v53 = vshrl.u32 %v448_v41, 30  ;;  %v533_v54 = vor.u32 %v532_v38, %v531_v45  ;;  %v550_v55 = vshll.u32 %v510_v26, 8  ;;  %v339_v56 = vadd.s32 %v1083_v25, %v1080_v24 }
  0xb8   : > { %v351_v47 = vclz %v828_v17  ;;  %v543_v59 = vsel %vm537_vm13, %v530_v43, 920167782  ;;  %v610_v60 = vshrl.u32 %v609_v27, 23  ;;  %v518_v62 = vshrl.u32 %v956_v42, %v517_v12 }
  0xb9   : > { %v450_v61 = vshll.u32 %v1142_v53, 30  ;;  %vm534_vm14 = vcmp.lt.s32.totalorder %v1127_v30, 1  ;;  %vm536_vm15 = vcmp.lt.s32.totalorder %v1127_v30, 3  ;;  %vm535_vm1 = vcmp.lt.s32.totalorder %v1127_v30, 2 }
  0xba   : > { %v829_v58 = vadd.s32 4294967294, %v351_v47  ;;  %v542_v63 = vsel %vm534_vm14, %v521_v49, %v524_v51  ;;  %v544_v24 = vsel %vm536_vm15, %v527_v52, %v543_v59  ;;  %v546_v1 = vsel %vm534_vm14, %v524_v51, %v527_v52 }
  0xbb   : > { %v451_v0 = vsub.s32 %v447_v36, %v450_v61  ;;  %v547_v2 = vsel %vm537_vm13, %v533_v54, 1326507024  ;;  %v538_v7 = vsel %vm534_vm14, %v518_v62, %v521_v49  ;;  %v539_v9 = vsel %vm537_vm13, %v527_v52, 2102212464 }
  0xbc   : > { %vm830_vm0 = vcmp.lt.s32.totalorder %v829_v58, 0  ;;  %v545_v16 = vsel %vm535_vm1, %v542_v63, %v544_v24  ;;  %v548_v22 = vsel %vm536_vm15, %v530_v43, %v547_v2  ;;  %v840_v31 = vadd.s32 4294967169, %v610_v60 }
  0xbd   : > { %v354_v25 = vsel %vm830_vm0, 0, %v829_v58  ;;  %v453_v14 = vsub.s32 0, %v451_v0  ;;  %v549_v28 = vsel %vm535_vm1, %v546_v1, %v548_v22  ;;  %v540_v8 = vsel %vm536_vm15, %v524_v51, %v539_v9 }
  0xbe   : > { %v355_v3 = vsub.s32 32, %v354_v25  ;;  %v359_v5 = vsub.s32 4294967266, %v354_v25  ;;  %v356_v12 = vshll.u32 %v1120_v19, %v354_v25  ;;  %v541_v33 = vsel %vm535_vm1, %v538_v7, %v540_v8 }
  0xbf   : > { %v832_v32 = vmin.u32 %v453_v14, %v451_v0  ;;  %v1169_v34 = vmul.u32.u64.low %v550_v55, %v549_v28  ;;  %v1170_v35 = vmul.u32.u64.high %v550_v55, %v549_v28, %v1169_v34  ;;  %v616_v37 = vadd.s32 1, %v840_v31 }
  0xc0   : > { %v357_v26 = vshrl.u32 %v339_v56, %v355_v3  ;;  %v360_v27 = vadd.s32 127, %v359_v5  ;;  %v1172_v21 = vmul.u32.u64.low %v550_v55, %v545_v16  ;;  %v1173_v29 = vmul.u32.u64.high %v550_v55, %v545_v16, %v1172_v21 }
  0xc1   : > { %v455_v39 = vclz %v832_v32  ;;  %vm617_vm3 = vcmp.gt.s32.totalorder %v616_v37, 0  ;;  %v557_v47 = vmul.u32 %v550_v55, %v541_v33  ;;  %v606_v49 = vand.u32 2147483647, %v1072_v20 }
  0xc2   : > { %v358_v19 = vor.u32 %v357_v26, %v356_v12  ;;  %v361_v36 = vshll.u32 %v360_v27, 23  ;;  %vm559_vm2 = vc.u32 %v1170_v35, %v1172_v21  ;;  %v560_v45 = vadd.s32 1, %v1173_v29 }
  0xc3   : > { %v833_v38 = vadd.s32 4294967294, %v455_v39  ;;  %v618_v51 = vsel %vm617_vm3, %v616_v37, 0  ;;  %v369_v54 = vsub.s32 4, %v1108_v4  ;;  %v443_v58 = vadd.s32 %v1111_v6, %v1116_v10 }
  0xc4   : > { %v362_v17 = vor.u32 4788187, %v361_v36  ;;  %v365_v43 = vcvt.s32.f32 %v358_v19  ;;  %v561_v56 = vsel %vm559_vm2, %v560_v45, %v1173_v29  ;;  %vm285_vm6 = vcmp.lt.s32.totalorder %v1027_v11, 0 }
  0xc5   : > { %vm834_vm4 = vcmp.lt.s32.totalorder %v833_v38, 0  ;;  %v562_v61 = vadd.s32 %v561_v56, %v557_v47  ;;  %v620_v63 = vand.u32 31, %v618_v51  ;;  %vm389_vm7 = vcmp.lt.s32.totalorder %v1036_v18, 0 }
  0xc6   : > { %v363_v41 = vand.u32 2147483647, %v362_v17  ;;  %v458_v30 = vsel %vm834_vm4, 0, %v833_v38  ;;  %v1195_v10 = vsel %vm285_vm6, %v369_v54, %v1108_v4  ;;  %v613_v15 = vand.u32 8388607, %v606_v49 }
  0xc7   : > { %v459_v59 = vsub.s32 32, %v458_v30  ;;  %v463_v60 = vsub.s32 4294967266, %v458_v30  ;;  %v460_v24 = vshll.u32 %v451_v0, %v458_v30  ;;  %v563_v2 = vadd.s32 536870912, %v562_v61 }
  0xc8   : > { %v366_v52 = vmul.f32 %v365_v43, %v363_v41  ;;  %v621_v3 = vsub.s32 32, %v620_v63  ;;  %v473_v0 = vsub.s32 4, %v1142_v53  ;;  %v623_v14 = vshll.u32 %v956_v42, %v620_v63 }
  0xc9   : > { %v461_v25 = vshrl.u32 %v443_v58, %v459_v59  ;;  %v464_v1 = vadd.s32 127, %v463_v60  ;;  %v1202_v12 = vshrl.u32 %v563_v2, 30  ;;  %vm1210_vm8 = vcmp.le.f32.partialorder %v387_v23, 0.7853982 }
  0xca   : > { %v367_v55 = vxor.u32 2147483648, %v366_v52  ;;  %v624_v16 = vshrl.u32 %v957_v44, %v621_v3  ;;  %v627_v4 = vshrl.u32 %v958_v46, %v621_v3  ;;  %v619_v28 = vshrl.u32 %v618_v51, 5 }
  0xcb   : > { %v462_v7 = vor.u32 %v461_v25, %v460_v24  ;;  %v465_v9 = vshll.u32 %v464_v1, 23  ;;  %v565_v27 = vshll.u32 %v1202_v12, 30  ;;  %v626_v8 = vshll.u32 %v957_v44, %v620_v63 }
  0xcc   : > { %v368_v6 = vsel %vm285_vm6, %v367_v55, %v366_v52  ;;  %v625_v32 = vor.u32 %v624_v16, %v623_v14  ;;  %v629_v36 = vshll.u32 %v958_v46, %v620_v63  ;;  %v630_v29 = vshrl.u32 %v959_v48, %v621_v3 }
  0xcd   : > { %v371_v5 = vsel %vm1188_vm5, %v1027_v11, %v368_v6  ;;  %v466_v26 = vor.u32 4788187, %v465_v9  ;;  %v469_v31 = vcvt.s32.f32 %v462_v7  ;;  %v1216_v19 = vsub.s32 %v562_v61, %v565_v27 }
  0xce   : > { %915 = vcosq.f32 %v371_v5  ;;  %v628_v23 = vor.u32 %v627_v4, %v626_v8  ;;  %v632_v39 = vshll.u32 %v959_v48, %v620_v63  ;;  %v633_v17 = vshrl.u32 %v960_v50, %v621_v3 }
  0xcf   : > { %917 = vsinq.f32 %v371_v5  ;;  %v467_v34 = vand.u32 2147483647, %v466_v26  ;;  %v636_v33 = vshrl.u32 %v961_v57, %v621_v3  ;;  %v568_v38 = vsub.s32 0, %v1216_v19 }
  0xd0   : > { %v614_v41 = vor.u32 8388608, %v613_v15  ;;  %v631_v43 = vor.u32 %v630_v29, %v629_v36  ;;  %v372_v44 = vsel %vm1188_vm5, 0, %v1195_v10  ;;  %v474_v46 = vsel %vm389_vm7, %v473_v0, %v1142_v53 }
  0xd1   : > { %v470_v37 = vmul.f32 %v469_v31, %v467_v34  ;;  %v634_v45 = vor.u32 %v633_v17, %v632_v39  ;;  %v635_v48 = vshll.u32 %v960_v50, %v620_v63  ;;  %v837_v51 = vmin.u32 %v568_v38, %v1216_v19 }
  0xd2   : > { %vm638_vm9 = vcmp.lt.s32.totalorder %v619_v28, 1  ;;  %vm641_vm10 = vcmp.lt.s32.totalorder %v619_v28, 4  ;;  %vm640_vm11 = vcmp.lt.s32.totalorder %v619_v28, 3  ;;  %v654_v58 = vshll.u32 %v614_v41, 8 }
  0xd3   : > { %v471_v47 = vxor.u32 2147483648, %v470_v37  ;;  %v637_v57 = vor.u32 %v636_v33, %v635_v48  ;;  %v646_v52 = vsel %vm638_vm9, %v625_v32, %v628_v23  ;;  %v647_v54 = vsel %vm641_vm10, %v634_v45, 920167782 }
  0xd4   : > { %v570_v56 = vclz %v837_v51  ;;  %v648_v53 = vsel %vm640_vm11, %v631_v43, %v647_v54  ;;  %v622_v59 = vshrl.u32 %v956_v42, %v621_v3  ;;  %vm639_vm12 = vcmp.lt.s32.totalorder %v619_v28, 2 }
  0xd5   : > { %v472_v30 = vsel %vm389_vm7, %v471_v47, %v470_v37  ;;  %v643_v60 = vsel %vm641_vm10, %v631_v43, 2102212464  ;;  %v649_v62 = vsel %vm639_vm12, %v646_v52, %v648_v53  ;;  %v650_v55 = vsel %vm638_vm9, %v628_v23, %v631_v43 }
  0xd6   : > { %v475_v50 = vsel %vm1210_vm8, %v1036_v18, %v472_v30  ;;  %v838_v61 = vadd.s32 4294967294, %v570_v56  ;;  %v651_v63 = vsel %vm641_vm10, %v637_v57, 1326507024  ;;  %v642_v1 = vsel %vm638_vm9, %v622_v59, %v625_v32 }
  0xd7   : > { %919 = vcosq.f32 %v475_v50  ;;  %v1245_v24 = vmul.u32.u64.low %v654_v58, %v649_v62  ;;  %v1246_v25 = vmul.u32.u64.high %v654_v58, %v649_v62, %v1245_v24  ;;  %v644_v42 = vsel %vm640_vm11, %v628_v23, %v643_v60 }
  0xd8   : > { %921 = vsinq.f32 %v475_v50  ;;  %vm839_vm13 = vcmp.lt.s32.totalorder %v838_v61, 0  ;;  %v652_v2 = vsel %vm640_vm11, %v634_v45, %v651_v63  ;;  %v376_v5 = vadd.s32 3, %v372_v44 }
  0xd9   : > { %v573_v10 = vsel %vm839_vm13, 0, %v838_v61  ;;  %v653_v15 = vsel %vm639_vm12, %v650_v55, %v652_v2  ;;  %v476_v7 = vsel %vm1210_vm8, 0, %v474_v46  ;;  %v645_v0 = vsel %vm639_vm12, %v642_v1, %v644_v42 }
  0xda   : > { %v578_v9 = vsub.s32 4294967266, %v573_v10  ;;  %v1256_v14 = vmul.u32.u64.low %v654_v58, %v653_v15  ;;  %v1257_v16 = vmul.u32.u64.high %v654_v58, %v653_v15, %v1256_v14  ;;  %v664_v4 = vadd.s32 1, %v1246_v25 }
  0xdb   : > { %v916_v6 = vpop.eup %915  ;;  %v480_v26 = vadd.s32 3, %v476_v7  ;;  %v377_v27 = vand.u32 3, %v376_v5  ;;  %v661_v31 = vmul.u32 %v654_v58, %v645_v0  ;;  %v574_v29 = vsub.s32 32, %v573_v10 }
  0xdc   : > { %v918_v3 = vpop.eup %917  ;;  %v383_v8 = vxor.u32 2147483648, %v916_v6  ;;  %v579_v34 = vadd.s32 127, %v578_v9  ;;  %vm663_vm14 = vc.u32 %v1257_v16, %v1245_v24  ;;  %v558_v23 = vadd.s32 %v1172_v21, %v1170_v35 }
  0xdd   : > { %v380_v32 = vxor.u32 2147483648, %v918_v3  ;;  %v665_v22 = vsel %vm663_vm14, %v664_v4, %v1246_v25  ;;  %v481_v36 = vand.u32 3, %v480_v26  ;;  %vm379_vm15 = vcmp.eq.s32.totalorder %v377_v27, 0 }
  0xde   : > { %v666_v28 = vadd.s32 %v665_v22, %v661_v31  ;;  %vm382_vm0 = vcmp.eq.s32.totalorder %v377_v27, 2  ;;  %v580_v37 = vshll.u32 %v579_v34, 23  ;;  %vm378_vm1 = vcmp.lt.s32.totalorder %v377_v27, 2 }
  0xdf   : > { %v381_v17 = vsel %vm379_vm15, %v916_v6, %v380_v32  ;;  %v384_v33 = vsel %vm382_vm0, %v383_v8, %v918_v3  ;;  %vm486_vm2 = vcmp.eq.s32.totalorder %v481_v36, 2  ;;  %v576_v46 = vshrl.u32 %v558_v23, %v574_v29 }
  0xe0   : > { %v667_v38 = vadd.s32 536870912, %v666_v28  ;;  %v385_v48 = vsel %vm378_vm1, %v381_v17, %v384_v33  ;;  %vm482_vm3 = vcmp.lt.s32.totalorder %v481_v36, 2  ;;  %vm483_vm4 = vcmp.eq.s32.totalorder %v481_v36, 0 }
  0xe1   : > { %v575_v35 = vshll.u32 %v1216_v19, %v573_v10  ;;  %v581_v21 = vor.u32 4788187, %v580_v37  ;;  %vm375_vm5 = vweird.f32 %v1027_v11  ;;  %vm479_vm6 = vweird.f32 %v1036_v18 }
  0xe2   : > { %v668_v45 = vshrl.u32 %v667_v38, 30  ;;  %v386_v54 = vsel %vm375_vm5, nan, %v385_v48  ;;  %v662_v63 = vadd.s32 %v1245_v24, %v1257_v16  ;;  %vm504_vm8 = vcmp.lt.s32.totalorder %v1029_v13, 0 }
  0xe3   : > { %v577_v56 = vor.u32 %v576_v46, %v575_v35  ;;  %v582_v50 = vand.u32 2147483647, %v581_v21  ;;  %vm1282_vm9 = vcmp.le.f32.partialorder %v502_v40, 0.7853982  ;;  %v588_v14 = vsub.s32 4, %v1202_v12 }
  0xe4   : > { %v920_v39 = vpop.eup %919  ;;  %v669_v57 = vshll.u32 %v668_v45, 30  ;;  %vm608_vm10 = vcmp.lt.s32.totalorder %v1072_v20, 0  ;;  %v692_v40 = vsub.s32 4, %v668_v45  ;;  %vm607_vm11 = vcmp.le.f32.partialorder %v606_v49, 0.7853982 }
  0xe5   : > { %v922_v41 = vpop.eup %921  ;;  %v487_v43 = vxor.u32 2147483648, %v920_v39  ;;  %v584_v59 = vcvt.s32.f32 %v577_v56  ;;  %v589_v26 = vsel %vm504_vm8, %v588_v14, %v1202_v12 }
  0xe6   : > { %v484_v44 = vxor.u32 2147483648, %v922_v41  ;;  %v670_v53 = vsub.s32 %v666_v28, %v669_v57  ;;  %v591_v32 = vsel %vm1282_vm9, 0, %v589_v26  ;;  %v693_v8 = vsel %vm608_vm10, %v692_v40, %v668_v45 }
  0xe7   : > { %v488_v47 = vsel %vm486_vm2, %v487_v43, %v922_v41  ;;  %v585_v11 = vmul.f32 %v584_v59, %v582_v50  ;;  %v595_v34 = vadd.s32 3, %v591_v32  ;;  %v695_v22 = vsel %vm607_vm11, 0, %v693_v8 }
  0xe8   : > { %v485_v51 = vsel %vm483_vm4, %v920_v39, %v484_v44  ;;  %v672_v19 = vsub.s32 0, %v670_v53  ;;  %v699_v28 = vadd.s32 3, %v695_v22  ;;  %vm594_vm2 = vweird.f32 %v1029_v13 }
  0xe9   : > { %v489_v52 = vsel %vm482_vm3, %v485_v51, %v488_v47  ;;  %v586_v62 = vxor.u32 2147483648, %v585_v11  ;;  %v596_v23 = vand.u32 3, %v595_v34  ;;  %vm698_vm3 = vweird.f32 %v1072_v20 }
  0xea   : > { %v490_v30 = vsel %vm479_vm6, nan, %v489_v52  ;;  %v841_v60 = vmin.u32 %v672_v19, %v670_v53  ;;  %v700_v17 = vand.u32 3, %v699_v28 }
  0xeb   : > { %v858_v58 = vpack.c.bf16 %v490_v30, %v386_v54  ;;  %v587_v42 = vsel %vm504_vm8, %v586_v62, %v585_v11  ;;  %vm598_vm12 = vcmp.eq.s32.totalorder %v596_v23, 0  ;;  %vm601_vm13 = vcmp.eq.s32.totalorder %v596_v23, 2 }
  0xec   : > { %v674_v61 = vclz %v841_v60  ;;  %v590_v24 = vsel %vm1282_vm9, %v1029_v13, %v587_v42  ;;  %vm597_vm14 = vcmp.lt.s32.totalorder %v596_v23, 2  ;;  %vm705_vm15 = vcmp.eq.s32.totalorder %v700_v17, 2 }
  0xed   : > { %859 = vst [vmem:[%s1272_s10] sm:$0xff] %v858_v58   ;;  %923 = vcosq.f32 %v590_v24  ;;  %vm702_vm0 = vcmp.eq.s32.totalorder %v700_v17, 0  ;;  %vm701_vm1 = vcmp.lt.s32.totalorder %v700_v17, 2 }
  0xee   : > { %v842_v18 = vadd.s32 4294967294, %v674_v61  ;;  %925 = vsinq.f32 %v590_v24 }
  0xf0   : > { %vm843_vm7 = vcmp.lt.s32.totalorder %v842_v18, 0 }
  0xf1   : > { %v677_v55 = vsel %vm843_vm7, 0, %v842_v18 }
  0xf2   : > { %v678_v25 = vsub.s32 32, %v677_v55  ;;  %v682_v1 = vsub.s32 4294967266, %v677_v55  ;;  %v679_v2 = vshll.u32 %v670_v53, %v677_v55 }
  0xf4   : > { %v680_v6 = vshrl.u32 %v662_v63, %v678_v25  ;;  %v683_v10 = vadd.s32 127, %v682_v1 }
  0xf6   : > { %v681_v3 = vor.u32 %v680_v6, %v679_v2  ;;  %v684_v5 = vshll.u32 %v683_v10, 23 }
  0xf8   : > { %v685_v7 = vor.u32 4788187, %v684_v5  ;;  %v688_v0 = vcvt.s32.f32 %v681_v3 }
  0xfa   : > { %v686_v9 = vand.u32 2147483647, %v685_v7  ;;  %v924_v36 = vpop.eup %923 }
  0xfb   : > { %v926_v29 = vpop.eup %925  ;;  %v602_v12 = vxor.u32 2147483648, %v924_v36 }
  0xfc   : > { %v689_v16 = vmul.f32 %v688_v0, %v686_v9  ;;  %v599_v39 = vxor.u32 2147483648, %v926_v29 }
  0xfd   : > { %v603_v37 = vsel %vm601_vm13, %v602_v12, %v926_v29 }
  0xfe   : > { %v690_v4 = vxor.u32 2147483648, %v689_v16  ;;  %v600_v33 = vsel %vm598_vm12, %v924_v36, %v599_v39 }
  0xff   : > { %v604_v44 = vsel %vm597_vm14, %v600_v33, %v603_v37 }
 0x100   : > { %v691_v27 = vsel %vm608_vm10, %v690_v4, %v689_v16  ;;  %v605_v47 = vsel %vm594_vm2, nan, %v604_v44 }
 0x101   : > { %v694_v31 = vsel %vm607_vm11, %v1072_v20, %v691_v27 }
 0x102   : > { %927 = vcosq.f32 %v694_v31 }
 0x103   : > { %929 = vsinq.f32 %v694_v31 }
 0x10f   : > { %v928_v49 = vpop.eup %927 }
 0x110   : > { %v930_v38 = vpop.eup %929  ;;  %v706_v41 = vxor.u32 2147483648, %v928_v49 }
 0x111   : > { %v703_v43 = vxor.u32 2147483648, %v930_v38 }
 0x112   : > { %v707_v46 = vsel %vm705_vm15, %v706_v41, %v930_v38 }
 0x113   : > { %v704_v45 = vsel %vm702_vm0, %v928_v49, %v703_v43 }
 0x114   : > { %v708_v48 = vsel %vm701_vm1, %v704_v45, %v707_v46 }
 0x115   : > { %v709_v51 = vsel %vm698_vm3, nan, %v708_v48 }
 0x116   : > { %v863_v35 = vpack.c.bf16 %v709_v51, %v605_v47 }
 0x118   : > { %865 = vst [vmem:[%s1272_s10 + $0x8] sm:$0xff] %v863_v35  }
 0x119 PF: > { %s14_s17 = sadd.s32 1, %s953_s17   ;;  %s1322_s15 = smov %s949_s16 }
 0x11a   : > { %p11_p5 = scmp.ge.s32.totalorder %s14_s17, 4   ;;  %s1323_s16 = smov %s1325_s18 }
 0x11c   :  { %13 = sbr.rel (!%p11_p5) target bundleno = 2 (0x2), region = 69 }

</bundles_post_ra>
